<compile_context>
chip_gen: v5e
topology: v5e:2x2
jax: 0.10.0
libtpu: 0.0.40
codegen_flags: <defaults>
</compile_context>

<pallas_src>
import functools

import jax
import jax.numpy as jnp
from jax import lax
from jax.experimental import pallas as pl

LANE = 128  # TPU vreg lane width; one 128-lane group per GRU gate [r | z | n]


# ----------------------------- Pallas kernel --------------------------------
def gru_fused_kernel(ids_ref, emb_ref, w_ih_ref, b_gi_ref, w_hh_ref, b_hn_ref,
                     w_fc_ref, b_fc_ref, sl_ref, out_ref, *, L, B, H):
    """Single-invocation fused GRU forward (everything VMEM resident).

    ids_ref   : (L*B, 1) int32   token ids, time-major rows [t*B:(t+1)*B]
    emb_ref   : (n_emb_pad, E)   embedding table (rows padded to a multiple of 8)
    w_ih_ref  : (E, 3*128)       input->hidden weights, gate g at lanes [g*128, g*128+H)
    b_gi_ref  : (1, 3*128)       folded bias [b_ir+b_hr | b_iz+b_hz | b_in], same packing
    w_hh_ref  : (H, 3*128)       hidden->hidden weights, same gate packing
    b_hn_ref  : (1, H)           b_hn (must stay inside r * (...))
    w_fc_ref  : (H, C_pad)       final linear weight, transposed, lane-padded to 128
    b_fc_ref  : (1, C_pad)
    sl_ref    : (L, 1)           mean-pool divisor
    out_ref   : (L, C_pad)       lane-dense logits (caller slices [:, :C])
    """
    n_emb_pad = emb_ref.shape[0]

    # ---- fused embedding gather (one-hot MXU matmul) + hoisted input projection ----
    ids = ids_ref[...]                                                   # (L*B, 1)
    iota = lax.broadcasted_iota(jnp.int32, (L * B, n_emb_pad), 1)
    onehot = (iota == ids).astype(jnp.float32)                           # (L*B, n_emb_pad)
    emb = jnp.dot(onehot, emb_ref[...], preferred_element_type=jnp.float32)     # (L*B, E)
    gi = jnp.dot(emb, w_ih_ref[...], preferred_element_type=jnp.float32) \
        + b_gi_ref[...]                                                  # (L*B, 3*128)
    # Gate slicing happens ONCE here; each gate group starts on a vreg boundary.
    gi_r = gi[:, 0:H]
    gi_z = gi[:, LANE:LANE + H]
    gi_n = gi[:, 2 * LANE:2 * LANE + H]

    w_hh = w_hh_ref[...]                                                 # (H, 3*128)
    b_hn = b_hn_ref[...]                                                 # (1, H)

    # ---- serial recurrence: ONE fused matmul per step on the h carry chain --------
    # TODO(synk): for long L, keep GI in a VMEM scratch and switch to lax.fori_loop
    # (unroll 2-4) with pl.multiple_of(t*B, B) row offsets to bound vreg pressure.
    h = jnp.zeros((B, H), jnp.float32)
    hs = []
    for t in range(L):
        lo = t * B
        gh = jnp.dot(h, w_hh, preferred_element_type=jnp.float32)        # (B, 3*128)
        r = jax.nn.sigmoid(gi_r[lo:lo + B, :] + gh[:, 0:H])
        z = jax.nn.sigmoid(gi_z[lo:lo + B, :] + gh[:, LANE:LANE + H])
        n = jnp.tanh(gi_n[lo:lo + B, :] + r * (gh[:, 2 * LANE:2 * LANE + H] + b_hn))
        h = (1.0 - z) * n + z * h                                        # (B, H)
        hs.append(h)                                                     # stays in vregs

    # ---- mean-pool (exact f32 sums, true divide) + lane-dense final Linear --------
    sums = jnp.concatenate([jnp.sum(ht, axis=0, keepdims=True) for ht in hs],
                           axis=0)                                       # (L, H)
    rep = sums / sl_ref[...]                                             # (L, H)
    logits = jnp.dot(rep, w_fc_ref[...], preferred_element_type=jnp.float32) \
        + b_fc_ref[...]                                                  # (L, C_pad)
    out_ref[...] = logits.astype(out_ref.dtype)


# --------------------- one-time parameter preparation ------------------------
def prepare_params(params):
    """One-time weight packing (hoisted out of the per-call jitted path)."""
    emb_table = jnp.asarray(params["emb_table"], jnp.float32)   # (n_emb, E)
    w_ih = jnp.asarray(params["w_ih"], jnp.float32)             # (3H, E), rows [r|z|n]
    w_hh = jnp.asarray(params["w_hh"], jnp.float32)             # (3H, H)
    b_ih = jnp.asarray(params["b_ih"], jnp.float32)             # (3H,)
    b_hh = jnp.asarray(params["b_hh"], jnp.float32)             # (3H,)
    w_fc = jnp.asarray(params["w_fc"], jnp.float32)             # (C, H)
    b_fc = jnp.asarray(params["b_fc"], jnp.float32)             # (C,)

    n_emb, E = emb_table.shape
    H = w_hh.shape[1]
    C = w_fc.shape[0]

    n_emb_pad = ((n_emb + 7) // 8) * 8
    emb_pad = jnp.zeros((n_emb_pad, E), jnp.float32).at[:n_emb, :].set(emb_table)

    # Fold b_ir+b_hr and b_iz+b_hz into the hoisted input-projection bias;
    # b_hn must stay separate (it lives inside r * (...)).
    b_gi = b_ih + jnp.concatenate([b_hh[:2 * H], jnp.zeros((H,), jnp.float32)])

    w_ih_t = w_ih.T                                             # (E, 3H)
    w_hh_t = w_hh.T                                             # (H, 3H)
    w_ih_pack = jnp.zeros((E, 3 * LANE), jnp.float32)
    w_hh_pack = jnp.zeros((H, 3 * LANE), jnp.float32)
    b_gi_pack = jnp.zeros((1, 3 * LANE), jnp.float32)
    for g in range(3):  # one 128-lane group per gate [r | z | n]
        w_ih_pack = w_ih_pack.at[:, g * LANE:g * LANE + H].set(w_ih_t[:, g * H:(g + 1) * H])
        w_hh_pack = w_hh_pack.at[:, g * LANE:g * LANE + H].set(w_hh_t[:, g * H:(g + 1) * H])
        b_gi_pack = b_gi_pack.at[0, g * LANE:g * LANE + H].set(b_gi[g * H:(g + 1) * H])

    b_hn = b_hh[2 * H:3 * H].reshape(1, H)

    C_pad = ((C + LANE - 1) // LANE) * LANE                      # lane-dense logits
    w_fc_pack = jnp.zeros((H, C_pad), jnp.float32).at[:, :C].set(w_fc.T)
    b_fc_pack = jnp.zeros((1, C_pad), jnp.float32).at[0, :C].set(b_fc)

    prep = dict(emb_pad=emb_pad, w_ih_pack=w_ih_pack, b_gi_pack=b_gi_pack,
                w_hh_pack=w_hh_pack, b_hn=b_hn, w_fc_pack=w_fc_pack,
                b_fc_pack=b_fc_pack)
    return prep, C


# ------------------------------ JAX wrapper ----------------------------------
@functools.partial(jax.jit, static_argnames=("n_cls",))
def gru_forward(x, sl, prep, *, n_cls):
    """x: (L, B) int32 token ids, sl: (L,) divisor. Returns (L, n_cls) logits."""
    L, B = x.shape
    H = prep["w_hh_pack"].shape[0]
    C_pad = prep["w_fc_pack"].shape[1]

    ids2d = x.reshape(L * B, 1).astype(jnp.int32)
    sl2d = sl.astype(jnp.float32).reshape(L, 1)

    kernel = functools.partial(gru_fused_kernel, L=L, B=B, H=H)
    # Single invocation, no grid: the whole working set (< 200 KB) lives in VMEM.
    # TODO(synk): for multi-sequence serving, add a leading "parallel" grid axis over
    # independent sequences (uses v7x's 2nd TensorCore) or co-batch them into B.
    logits_pad = pl.pallas_call(
        kernel,
        out_shape=jax.ShapeDtypeStruct((L, C_pad), jnp.float32),
    )(ids2d, prep["emb_pad"], prep["w_ih_pack"], prep["b_gi_pack"],
      prep["w_hh_pack"], prep["b_hn"], prep["w_fc_pack"], prep["b_fc_pack"], sl2d)
    return logits_pad[:, :n_cls]


# ------------------------- pure-JAX reference ---------------------------------
def gru_forward_ref(x, sl, params):
    emb = params["emb_table"][x]                              # (L, B, E)
    w_ih, w_hh = params["w_ih"], params["w_hh"]
    b_ih, b_hh = params["b_ih"], params["b_hh"]
    H = w_hh.shape[1]
    B = x.shape[1]

    def step(h, x_t):
        gi = x_t @ w_ih.T + b_ih
        gh = h @ w_hh.T + b_hh
        r = jax.nn.sigmoid(gi[:, :H] + gh[:, :H])
        z = jax.nn.sigmoid(gi[:, H:2 * H] + gh[:, H:2 * H])
        n = jnp.tanh(gi[:, 2 * H:] + r * gh[:, 2 * H:])
        h_new = (1.0 - z) * n + z * h
        return h_new, h_new

    h0 = jnp.zeros((B, H), jnp.float32)
    _, outs = lax.scan(step, h0, emb)                         # (L, B, H)
    rep = jnp.sum(outs, axis=1) / sl[:, None].astype(jnp.float32)
    return rep @ params["w_fc"].T + params["b_fc"]


# --------------------------------- main ---------------------------------------
if __name__ == "__main__":
    # Small, forward-implied shapes.
    n_emb, emb_dim, n_gru_hid, n_cls = 50, 32, 32, 8
    L, B = 8, 4                                               # x: (L, B) token ids

    key = jax.random.PRNGKey(0)
    keys = jax.random.split(key, 9)
    k = 1.0 / jnp.sqrt(jnp.float32(n_gru_hid))
    params = {
        "emb_table": jax.random.normal(keys[0], (n_emb, emb_dim), jnp.float32),
        "w_ih": jax.random.uniform(keys[1], (3 * n_gru_hid, emb_dim), jnp.float32, -k, k),
        "w_hh": jax.random.uniform(keys[2], (3 * n_gru_hid, n_gru_hid), jnp.float32, -k, k),
        "b_ih": jax.random.uniform(keys[3], (3 * n_gru_hid,), jnp.float32, -k, k),
        "b_hh": jax.random.uniform(keys[4], (3 * n_gru_hid,), jnp.float32, -k, k),
        "w_fc": jax.random.uniform(keys[5], (n_cls, n_gru_hid), jnp.float32, -k, k),
        "b_fc": jax.random.uniform(keys[6], (n_cls,), jnp.float32, -k, k),
    }

    x = jax.random.randint(keys[7], (L, B), 0, n_emb, dtype=jnp.int32)
    sl = jax.random.randint(keys[8], (L,), 1, B + 1).astype(jnp.float32)

    # One-time weight packing (transposes / gate packing / bias folding / lane padding)
    # — hoisted out of the per-call path per the perf review.
    prep, C = prepare_params(params)
    prep = jax.tree_util.tree_map(jax.block_until_ready, prep)

    # Dropout is eval-mode identity (no-op) in this forward pass.
    logits = gru_forward(x, sl, prep, n_cls=C)
    logits = jax.block_until_ready(logits)

    ref = gru_forward_ref(x, sl, params)
    assert logits.shape == (L, n_cls)
    assert jnp.allclose(logits, ref, rtol=1e-4, atol=2e-5), (
        f"max abs diff {jnp.max(jnp.abs(logits - ref))}")

    print("KERNEL_OK")
</pallas_src>

<mosaic_0001>
module attributes {stable_mosaic.version = 11 : i64} {
  func.func @gru_fused_kernel(%arg0: memref<32x1xi32, #tpu.memory_space<vmem>>, %arg1: memref<56x32xf32, #tpu.memory_space<vmem>>, %arg2: memref<32x384xf32, #tpu.memory_space<vmem>>, %arg3: memref<1x384xf32, #tpu.memory_space<vmem>>, %arg4: memref<32x384xf32, #tpu.memory_space<vmem>>, %arg5: memref<1x32xf32, #tpu.memory_space<vmem>>, %arg6: memref<32x128xf32, #tpu.memory_space<vmem>>, %arg7: memref<1x128xf32, #tpu.memory_space<vmem>>, %arg8: memref<8x1xf32, #tpu.memory_space<vmem>>, %arg9: memref<8x128xf32, #tpu.memory_space<vmem>>) attributes {dimension_semantics = [], scalar_prefetch = 0 : i64, scratch_operands = 0 : i64, tpu.core_type = #tpu.core_type<tc>} {
    %c0 = arith.constant 0 : index
    %c0_0 = arith.constant 0 : index
    %0 = vector.load %arg0[%c0, %c0_0] : memref<32x1xi32, #tpu.memory_space<vmem>>, vector<32x1xi32>
    %1 = tpu.iota {dimensions = array<i32: 1>} : vector<32x56xi32>
    %2 = vector.broadcast %0 : vector<32x1xi32> to vector<32x56xi32>
    %3 = arith.cmpi eq, %1, %2 : vector<32x56xi32>
    %4 = arith.extui %3 : vector<32x56xi1> to vector<32x56xi32>
    %5 = arith.sitofp %4 : vector<32x56xi32> to vector<32x56xf32>
    %c0_1 = arith.constant 0 : index
    %c0_2 = arith.constant 0 : index
    %6 = vector.load %arg1[%c0_1, %c0_2] : memref<56x32xf32, #tpu.memory_space<vmem>>, vector<56x32xf32>
    %cst = arith.constant dense<0.000000e+00> : vector<32x32xf32>
    %7 = tpu.matmul %5, %6, %cst {dimension_numbers = #tpu.dot_dimension_numbers<[1], [0], [0], [1], [0, 0, 1, 1], [], []>} : vector<32x56xf32>, vector<56x32xf32>, vector<32x32xf32> -> vector<32x32xf32>
    %c0_3 = arith.constant 0 : index
    %c0_4 = arith.constant 0 : index
    %8 = vector.load %arg2[%c0_3, %c0_4] : memref<32x384xf32, #tpu.memory_space<vmem>>, vector<32x384xf32>
    %cst_5 = arith.constant dense<0.000000e+00> : vector<32x384xf32>
    %9 = tpu.matmul %7, %8, %cst_5 {dimension_numbers = #tpu.dot_dimension_numbers<[1], [0], [0], [1], [0, 0, 1, 1], [], []>} : vector<32x32xf32>, vector<32x384xf32>, vector<32x384xf32> -> vector<32x384xf32>
    %c0_6 = arith.constant 0 : index
    %c0_7 = arith.constant 0 : index
    %10 = vector.load %arg3[%c0_6, %c0_7] : memref<1x384xf32, #tpu.memory_space<vmem>>, vector<1x384xf32>
    %11 = vector.broadcast %10 : vector<1x384xf32> to vector<32x384xf32>
    %12 = arith.addf %9, %11 : vector<32x384xf32>
    %13 = vector.extract_strided_slice %12 {offsets = [0, 0], sizes = [32, 32], strides = [1, 1]} : vector<32x384xf32> to vector<32x32xf32>
    %14 = vector.extract_strided_slice %12 {offsets = [0, 128], sizes = [32, 32], strides = [1, 1]} : vector<32x384xf32> to vector<32x32xf32>
    %15 = vector.extract_strided_slice %12 {offsets = [0, 256], sizes = [32, 32], strides = [1, 1]} : vector<32x384xf32> to vector<32x32xf32>
    %c0_8 = arith.constant 0 : index
    %c0_9 = arith.constant 0 : index
    %16 = vector.load %arg4[%c0_8, %c0_9] : memref<32x384xf32, #tpu.memory_space<vmem>>, vector<32x384xf32>
    %c0_10 = arith.constant 0 : index
    %c0_11 = arith.constant 0 : index
    %17 = vector.load %arg5[%c0_10, %c0_11] : memref<1x32xf32, #tpu.memory_space<vmem>>, vector<1x32xf32>
    %cst_12 = arith.constant 0.000000e+00 : f32
    %18 = vector.broadcast %cst_12 : f32 to vector<4x32xf32>
    %cst_13 = arith.constant dense<0.000000e+00> : vector<4x384xf32>
    %19 = tpu.matmul %18, %16, %cst_13 {dimension_numbers = #tpu.dot_dimension_numbers<[1], [0], [0], [1], [0, 0, 1, 1], [], []>} : vector<4x32xf32>, vector<32x384xf32>, vector<4x384xf32> -> vector<4x384xf32>
    %20 = vector.extract_strided_slice %13 {offsets = [0, 0], sizes = [4, 32], strides = [1, 1]} : vector<32x32xf32> to vector<4x32xf32>
    %21 = vector.extract_strided_slice %19 {offsets = [0, 0], sizes = [4, 32], strides = [1, 1]} : vector<4x384xf32> to vector<4x32xf32>
    %22 = arith.addf %20, %21 : vector<4x32xf32>
    %23 = arith.negf %22 : vector<4x32xf32>
    %24 = math.exp %23 : vector<4x32xf32>
    %cst_14 = arith.constant 1.000000e+00 : f32
    %25 = vector.broadcast %cst_14 : f32 to vector<4x32xf32>
    %26 = arith.addf %25, %24 : vector<4x32xf32>
    %27 = arith.divf %25, %26 : vector<4x32xf32>
    %28 = vector.extract_strided_slice %14 {offsets = [0, 0], sizes = [4, 32], strides = [1, 1]} : vector<32x32xf32> to vector<4x32xf32>
    %29 = vector.extract_strided_slice %19 {offsets = [0, 128], sizes = [4, 32], strides = [1, 1]} : vector<4x384xf32> to vector<4x32xf32>
    %30 = arith.addf %28, %29 : vector<4x32xf32>
    %31 = arith.negf %30 : vector<4x32xf32>
    %32 = math.exp %31 : vector<4x32xf32>
    %cst_15 = arith.constant 1.000000e+00 : f32
    %33 = vector.broadcast %cst_15 : f32 to vector<4x32xf32>
    %34 = arith.addf %33, %32 : vector<4x32xf32>
    %35 = arith.divf %33, %34 : vector<4x32xf32>
    %36 = vector.extract_strided_slice %15 {offsets = [0, 0], sizes = [4, 32], strides = [1, 1]} : vector<32x32xf32> to vector<4x32xf32>
    %37 = vector.extract_strided_slice %19 {offsets = [0, 256], sizes = [4, 32], strides = [1, 1]} : vector<4x384xf32> to vector<4x32xf32>
    %38 = vector.broadcast %17 : vector<1x32xf32> to vector<4x32xf32>
    %39 = arith.addf %37, %38 : vector<4x32xf32>
    %40 = arith.mulf %27, %39 : vector<4x32xf32>
    %41 = arith.addf %36, %40 : vector<4x32xf32>
    %42 = math.tanh %41 : vector<4x32xf32>
    %cst_16 = arith.constant 1.000000e+00 : f32
    %43 = vector.broadcast %cst_16 : f32 to vector<4x32xf32>
    %44 = arith.subf %43, %35 : vector<4x32xf32>
    %45 = arith.mulf %44, %42 : vector<4x32xf32>
    %46 = arith.mulf %35, %18 : vector<4x32xf32>
    %47 = arith.addf %45, %46 : vector<4x32xf32>
    %cst_17 = arith.constant dense<0.000000e+00> : vector<4x384xf32>
    %48 = tpu.matmul %47, %16, %cst_17 {dimension_numbers = #tpu.dot_dimension_numbers<[1], [0], [0], [1], [0, 0, 1, 1], [], []>} : vector<4x32xf32>, vector<32x384xf32>, vector<4x384xf32> -> vector<4x384xf32>
    %49 = vector.extract_strided_slice %13 {offsets = [4, 0], sizes = [4, 32], strides = [1, 1]} : vector<32x32xf32> to vector<4x32xf32>
    %50 = vector.extract_strided_slice %48 {offsets = [0, 0], sizes = [4, 32], strides = [1, 1]} : vector<4x384xf32> to vector<4x32xf32>
    %51 = arith.addf %49, %50 : vector<4x32xf32>
    %52 = arith.negf %51 : vector<4x32xf32>
    %53 = math.exp %52 : vector<4x32xf32>
    %cst_18 = arith.constant 1.000000e+00 : f32
    %54 = vector.broadcast %cst_18 : f32 to vector<4x32xf32>
    %55 = arith.addf %54, %53 : vector<4x32xf32>
    %56 = arith.divf %54, %55 : vector<4x32xf32>
    %57 = vector.extract_strided_slice %14 {offsets = [4, 0], sizes = [4, 32], strides = [1, 1]} : vector<32x32xf32> to vector<4x32xf32>
    %58 = vector.extract_strided_slice %48 {offsets = [0, 128], sizes = [4, 32], strides = [1, 1]} : vector<4x384xf32> to vector<4x32xf32>
    %59 = arith.addf %57, %58 : vector<4x32xf32>
    %60 = arith.negf %59 : vector<4x32xf32>
    %61 = math.exp %60 : vector<4x32xf32>
    %cst_19 = arith.constant 1.000000e+00 : f32
    %62 = vector.broadcast %cst_19 : f32 to vector<4x32xf32>
    %63 = arith.addf %62, %61 : vector<4x32xf32>
    %64 = arith.divf %62, %63 : vector<4x32xf32>
    %65 = vector.extract_strided_slice %15 {offsets = [4, 0], sizes = [4, 32], strides = [1, 1]} : vector<32x32xf32> to vector<4x32xf32>
    %66 = vector.extract_strided_slice %48 {offsets = [0, 256], sizes = [4, 32], strides = [1, 1]} : vector<4x384xf32> to vector<4x32xf32>
    %67 = vector.broadcast %17 : vector<1x32xf32> to vector<4x32xf32>
    %68 = arith.addf %66, %67 : vector<4x32xf32>
    %69 = arith.mulf %56, %68 : vector<4x32xf32>
    %70 = arith.addf %65, %69 : vector<4x32xf32>
    %71 = math.tanh %70 : vector<4x32xf32>
    %cst_20 = arith.constant 1.000000e+00 : f32
    %72 = vector.broadcast %cst_20 : f32 to vector<4x32xf32>
    %73 = arith.subf %72, %64 : vector<4x32xf32>
    %74 = arith.mulf %73, %71 : vector<4x32xf32>
    %75 = arith.mulf %64, %47 : vector<4x32xf32>
    %76 = arith.addf %74, %75 : vector<4x32xf32>
    %cst_21 = arith.constant dense<0.000000e+00> : vector<4x384xf32>
    %77 = tpu.matmul %76, %16, %cst_21 {dimension_numbers = #tpu.dot_dimension_numbers<[1], [0], [0], [1], [0, 0, 1, 1], [], []>} : vector<4x32xf32>, vector<32x384xf32>, vector<4x384xf32> -> vector<4x384xf32>
    %78 = vector.extract_strided_slice %13 {offsets = [8, 0], sizes = [4, 32], strides = [1, 1]} : vector<32x32xf32> to vector<4x32xf32>
    %79 = vector.extract_strided_slice %77 {offsets = [0, 0], sizes = [4, 32], strides = [1, 1]} : vector<4x384xf32> to vector<4x32xf32>
    %80 = arith.addf %78, %79 : vector<4x32xf32>
    %81 = arith.negf %80 : vector<4x32xf32>
    %82 = math.exp %81 : vector<4x32xf32>
    %cst_22 = arith.constant 1.000000e+00 : f32
    %83 = vector.broadcast %cst_22 : f32 to vector<4x32xf32>
    %84 = arith.addf %83, %82 : vector<4x32xf32>
    %85 = arith.divf %83, %84 : vector<4x32xf32>
    %86 = vector.extract_strided_slice %14 {offsets = [8, 0], sizes = [4, 32], strides = [1, 1]} : vector<32x32xf32> to vector<4x32xf32>
    %87 = vector.extract_strided_slice %77 {offsets = [0, 128], sizes = [4, 32], strides = [1, 1]} : vector<4x384xf32> to vector<4x32xf32>
    %88 = arith.addf %86, %87 : vector<4x32xf32>
    %89 = arith.negf %88 : vector<4x32xf32>
    %90 = math.exp %89 : vector<4x32xf32>
    %cst_23 = arith.constant 1.000000e+00 : f32
    %91 = vector.broadcast %cst_23 : f32 to vector<4x32xf32>
    %92 = arith.addf %91, %90 : vector<4x32xf32>
    %93 = arith.divf %91, %92 : vector<4x32xf32>
    %94 = vector.extract_strided_slice %15 {offsets = [8, 0], sizes = [4, 32], strides = [1, 1]} : vector<32x32xf32> to vector<4x32xf32>
    %95 = vector.extract_strided_slice %77 {offsets = [0, 256], sizes = [4, 32], strides = [1, 1]} : vector<4x384xf32> to vector<4x32xf32>
    %96 = vector.broadcast %17 : vector<1x32xf32> to vector<4x32xf32>
    %97 = arith.addf %95, %96 : vector<4x32xf32>
    %98 = arith.mulf %85, %97 : vector<4x32xf32>
    %99 = arith.addf %94, %98 : vector<4x32xf32>
    %100 = math.tanh %99 : vector<4x32xf32>
    %cst_24 = arith.constant 1.000000e+00 : f32
    %101 = vector.broadcast %cst_24 : f32 to vector<4x32xf32>
    %102 = arith.subf %101, %93 : vector<4x32xf32>
    %103 = arith.mulf %102, %100 : vector<4x32xf32>
    %104 = arith.mulf %93, %76 : vector<4x32xf32>
    %105 = arith.addf %103, %104 : vector<4x32xf32>
    %cst_25 = arith.constant dense<0.000000e+00> : vector<4x384xf32>
    %106 = tpu.matmul %105, %16, %cst_25 {dimension_numbers = #tpu.dot_dimension_numbers<[1], [0], [0], [1], [0, 0, 1, 1], [], []>} : vector<4x32xf32>, vector<32x384xf32>, vector<4x384xf32> -> vector<4x384xf32>
    %107 = vector.extract_strided_slice %13 {offsets = [12, 0], sizes = [4, 32], strides = [1, 1]} : vector<32x32xf32> to vector<4x32xf32>
    %108 = vector.extract_strided_slice %106 {offsets = [0, 0], sizes = [4, 32], strides = [1, 1]} : vector<4x384xf32> to vector<4x32xf32>
    %109 = arith.addf %107, %108 : vector<4x32xf32>
    %110 = arith.negf %109 : vector<4x32xf32>
    %111 = math.exp %110 : vector<4x32xf32>
    %cst_26 = arith.constant 1.000000e+00 : f32
    %112 = vector.broadcast %cst_26 : f32 to vector<4x32xf32>
    %113 = arith.addf %112, %111 : vector<4x32xf32>
    %114 = arith.divf %112, %113 : vector<4x32xf32>
    %115 = vector.extract_strided_slice %14 {offsets = [12, 0], sizes = [4, 32], strides = [1, 1]} : vector<32x32xf32> to vector<4x32xf32>
    %116 = vector.extract_strided_slice %106 {offsets = [0, 128], sizes = [4, 32], strides = [1, 1]} : vector<4x384xf32> to vector<4x32xf32>
    %117 = arith.addf %115, %116 : vector<4x32xf32>
    %118 = arith.negf %117 : vector<4x32xf32>
    %119 = math.exp %118 : vector<4x32xf32>
    %cst_27 = arith.constant 1.000000e+00 : f32
    %120 = vector.broadcast %cst_27 : f32 to vector<4x32xf32>
    %121 = arith.addf %120, %119 : vector<4x32xf32>
    %122 = arith.divf %120, %121 : vector<4x32xf32>
    %123 = vector.extract_strided_slice %15 {offsets = [12, 0], sizes = [4, 32], strides = [1, 1]} : vector<32x32xf32> to vector<4x32xf32>
    %124 = vector.extract_strided_slice %106 {offsets = [0, 256], sizes = [4, 32], strides = [1, 1]} : vector<4x384xf32> to vector<4x32xf32>
    %125 = vector.broadcast %17 : vector<1x32xf32> to vector<4x32xf32>
    %126 = arith.addf %124, %125 : vector<4x32xf32>
    %127 = arith.mulf %114, %126 : vector<4x32xf32>
    %128 = arith.addf %123, %127 : vector<4x32xf32>
    %129 = math.tanh %128 : vector<4x32xf32>
    %cst_28 = arith.constant 1.000000e+00 : f32
    %130 = vector.broadcast %cst_28 : f32 to vector<4x32xf32>
    %131 = arith.subf %130, %122 : vector<4x32xf32>
    %132 = arith.mulf %131, %129 : vector<4x32xf32>
    %133 = arith.mulf %122, %105 : vector<4x32xf32>
    %134 = arith.addf %132, %133 : vector<4x32xf32>
    %cst_29 = arith.constant dense<0.000000e+00> : vector<4x384xf32>
    %135 = tpu.matmul %134, %16, %cst_29 {dimension_numbers = #tpu.dot_dimension_numbers<[1], [0], [0], [1], [0, 0, 1, 1], [], []>} : vector<4x32xf32>, vector<32x384xf32>, vector<4x384xf32> -> vector<4x384xf32>
    %136 = vector.extract_strided_slice %13 {offsets = [16, 0], sizes = [4, 32], strides = [1, 1]} : vector<32x32xf32> to vector<4x32xf32>
    %137 = vector.extract_strided_slice %135 {offsets = [0, 0], sizes = [4, 32], strides = [1, 1]} : vector<4x384xf32> to vector<4x32xf32>
    %138 = arith.addf %136, %137 : vector<4x32xf32>
    %139 = arith.negf %138 : vector<4x32xf32>
    %140 = math.exp %139 : vector<4x32xf32>
    %cst_30 = arith.constant 1.000000e+00 : f32
    %141 = vector.broadcast %cst_30 : f32 to vector<4x32xf32>
    %142 = arith.addf %141, %140 : vector<4x32xf32>
    %143 = arith.divf %141, %142 : vector<4x32xf32>
    %144 = vector.extract_strided_slice %14 {offsets = [16, 0], sizes = [4, 32], strides = [1, 1]} : vector<32x32xf32> to vector<4x32xf32>
    %145 = vector.extract_strided_slice %135 {offsets = [0, 128], sizes = [4, 32], strides = [1, 1]} : vector<4x384xf32> to vector<4x32xf32>
    %146 = arith.addf %144, %145 : vector<4x32xf32>
    %147 = arith.negf %146 : vector<4x32xf32>
    %148 = math.exp %147 : vector<4x32xf32>
    %cst_31 = arith.constant 1.000000e+00 : f32
    %149 = vector.broadcast %cst_31 : f32 to vector<4x32xf32>
    %150 = arith.addf %149, %148 : vector<4x32xf32>
    %151 = arith.divf %149, %150 : vector<4x32xf32>
    %152 = vector.extract_strided_slice %15 {offsets = [16, 0], sizes = [4, 32], strides = [1, 1]} : vector<32x32xf32> to vector<4x32xf32>
    %153 = vector.extract_strided_slice %135 {offsets = [0, 256], sizes = [4, 32], strides = [1, 1]} : vector<4x384xf32> to vector<4x32xf32>
    %154 = vector.broadcast %17 : vector<1x32xf32> to vector<4x32xf32>
    %155 = arith.addf %153, %154 : vector<4x32xf32>
    %156 = arith.mulf %143, %155 : vector<4x32xf32>
    %157 = arith.addf %152, %156 : vector<4x32xf32>
    %158 = math.tanh %157 : vector<4x32xf32>
    %cst_32 = arith.constant 1.000000e+00 : f32
    %159 = vector.broadcast %cst_32 : f32 to vector<4x32xf32>
    %160 = arith.subf %159, %151 : vector<4x32xf32>
    %161 = arith.mulf %160, %158 : vector<4x32xf32>
    %162 = arith.mulf %151, %134 : vector<4x32xf32>
    %163 = arith.addf %161, %162 : vector<4x32xf32>
    %cst_33 = arith.constant dense<0.000000e+00> : vector<4x384xf32>
    %164 = tpu.matmul %163, %16, %cst_33 {dimension_numbers = #tpu.dot_dimension_numbers<[1], [0], [0], [1], [0, 0, 1, 1], [], []>} : vector<4x32xf32>, vector<32x384xf32>, vector<4x384xf32> -> vector<4x384xf32>
    %165 = vector.extract_strided_slice %13 {offsets = [20, 0], sizes = [4, 32], strides = [1, 1]} : vector<32x32xf32> to vector<4x32xf32>
    %166 = vector.extract_strided_slice %164 {offsets = [0, 0], sizes = [4, 32], strides = [1, 1]} : vector<4x384xf32> to vector<4x32xf32>
    %167 = arith.addf %165, %166 : vector<4x32xf32>
    %168 = arith.negf %167 : vector<4x32xf32>
    %169 = math.exp %168 : vector<4x32xf32>
    %cst_34 = arith.constant 1.000000e+00 : f32
    %170 = vector.broadcast %cst_34 : f32 to vector<4x32xf32>
    %171 = arith.addf %170, %169 : vector<4x32xf32>
    %172 = arith.divf %170, %171 : vector<4x32xf32>
    %173 = vector.extract_strided_slice %14 {offsets = [20, 0], sizes = [4, 32], strides = [1, 1]} : vector<32x32xf32> to vector<4x32xf32>
    %174 = vector.extract_strided_slice %164 {offsets = [0, 128], sizes = [4, 32], strides = [1, 1]} : vector<4x384xf32> to vector<4x32xf32>
    %175 = arith.addf %173, %174 : vector<4x32xf32>
    %176 = arith.negf %175 : vector<4x32xf32>
    %177 = math.exp %176 : vector<4x32xf32>
    %cst_35 = arith.constant 1.000000e+00 : f32
    %178 = vector.broadcast %cst_35 : f32 to vector<4x32xf32>
    %179 = arith.addf %178, %177 : vector<4x32xf32>
    %180 = arith.divf %178, %179 : vector<4x32xf32>
    %181 = vector.extract_strided_slice %15 {offsets = [20, 0], sizes = [4, 32], strides = [1, 1]} : vector<32x32xf32> to vector<4x32xf32>
    %182 = vector.extract_strided_slice %164 {offsets = [0, 256], sizes = [4, 32], strides = [1, 1]} : vector<4x384xf32> to vector<4x32xf32>
    %183 = vector.broadcast %17 : vector<1x32xf32> to vector<4x32xf32>
    %184 = arith.addf %182, %183 : vector<4x32xf32>
    %185 = arith.mulf %172, %184 : vector<4x32xf32>
    %186 = arith.addf %181, %185 : vector<4x32xf32>
    %187 = math.tanh %186 : vector<4x32xf32>
    %cst_36 = arith.constant 1.000000e+00 : f32
    %188 = vector.broadcast %cst_36 : f32 to vector<4x32xf32>
    %189 = arith.subf %188, %180 : vector<4x32xf32>
    %190 = arith.mulf %189, %187 : vector<4x32xf32>
    %191 = arith.mulf %180, %163 : vector<4x32xf32>
    %192 = arith.addf %190, %191 : vector<4x32xf32>
    %cst_37 = arith.constant dense<0.000000e+00> : vector<4x384xf32>
    %193 = tpu.matmul %192, %16, %cst_37 {dimension_numbers = #tpu.dot_dimension_numbers<[1], [0], [0], [1], [0, 0, 1, 1], [], []>} : vector<4x32xf32>, vector<32x384xf32>, vector<4x384xf32> -> vector<4x384xf32>
    %194 = vector.extract_strided_slice %13 {offsets = [24, 0], sizes = [4, 32], strides = [1, 1]} : vector<32x32xf32> to vector<4x32xf32>
    %195 = vector.extract_strided_slice %193 {offsets = [0, 0], sizes = [4, 32], strides = [1, 1]} : vector<4x384xf32> to vector<4x32xf32>
    %196 = arith.addf %194, %195 : vector<4x32xf32>
    %197 = arith.negf %196 : vector<4x32xf32>
    %198 = math.exp %197 : vector<4x32xf32>
    %cst_38 = arith.constant 1.000000e+00 : f32
    %199 = vector.broadcast %cst_38 : f32 to vector<4x32xf32>
    %200 = arith.addf %199, %198 : vector<4x32xf32>
    %201 = arith.divf %199, %200 : vector<4x32xf32>
    %202 = vector.extract_strided_slice %14 {offsets = [24, 0], sizes = [4, 32], strides = [1, 1]} : vector<32x32xf32> to vector<4x32xf32>
    %203 = vector.extract_strided_slice %193 {offsets = [0, 128], sizes = [4, 32], strides = [1, 1]} : vector<4x384xf32> to vector<4x32xf32>
    %204 = arith.addf %202, %203 : vector<4x32xf32>
    %205 = arith.negf %204 : vector<4x32xf32>
    %206 = math.exp %205 : vector<4x32xf32>
    %cst_39 = arith.constant 1.000000e+00 : f32
    %207 = vector.broadcast %cst_39 : f32 to vector<4x32xf32>
    %208 = arith.addf %207, %206 : vector<4x32xf32>
    %209 = arith.divf %207, %208 : vector<4x32xf32>
    %210 = vector.extract_strided_slice %15 {offsets = [24, 0], sizes = [4, 32], strides = [1, 1]} : vector<32x32xf32> to vector<4x32xf32>
    %211 = vector.extract_strided_slice %193 {offsets = [0, 256], sizes = [4, 32], strides = [1, 1]} : vector<4x384xf32> to vector<4x32xf32>
    %212 = vector.broadcast %17 : vector<1x32xf32> to vector<4x32xf32>
    %213 = arith.addf %211, %212 : vector<4x32xf32>
    %214 = arith.mulf %201, %213 : vector<4x32xf32>
    %215 = arith.addf %210, %214 : vector<4x32xf32>
    %216 = math.tanh %215 : vector<4x32xf32>
    %cst_40 = arith.constant 1.000000e+00 : f32
    %217 = vector.broadcast %cst_40 : f32 to vector<4x32xf32>
    %218 = arith.subf %217, %209 : vector<4x32xf32>
    %219 = arith.mulf %218, %216 : vector<4x32xf32>
    %220 = arith.mulf %209, %192 : vector<4x32xf32>
    %221 = arith.addf %219, %220 : vector<4x32xf32>
    %cst_41 = arith.constant dense<0.000000e+00> : vector<4x384xf32>
    %222 = tpu.matmul %221, %16, %cst_41 {dimension_numbers = #tpu.dot_dimension_numbers<[1], [0], [0], [1], [0, 0, 1, 1], [], []>} : vector<4x32xf32>, vector<32x384xf32>, vector<4x384xf32> -> vector<4x384xf32>
    %223 = vector.extract_strided_slice %13 {offsets = [28, 0], sizes = [4, 32], strides = [1, 1]} : vector<32x32xf32> to vector<4x32xf32>
    %224 = vector.extract_strided_slice %222 {offsets = [0, 0], sizes = [4, 32], strides = [1, 1]} : vector<4x384xf32> to vector<4x32xf32>
    %225 = arith.addf %223, %224 : vector<4x32xf32>
    %226 = arith.negf %225 : vector<4x32xf32>
    %227 = math.exp %226 : vector<4x32xf32>
    %cst_42 = arith.constant 1.000000e+00 : f32
    %228 = vector.broadcast %cst_42 : f32 to vector<4x32xf32>
    %229 = arith.addf %228, %227 : vector<4x32xf32>
    %230 = arith.divf %228, %229 : vector<4x32xf32>
    %231 = vector.extract_strided_slice %14 {offsets = [28, 0], sizes = [4, 32], strides = [1, 1]} : vector<32x32xf32> to vector<4x32xf32>
    %232 = vector.extract_strided_slice %222 {offsets = [0, 128], sizes = [4, 32], strides = [1, 1]} : vector<4x384xf32> to vector<4x32xf32>
    %233 = arith.addf %231, %232 : vector<4x32xf32>
    %234 = arith.negf %233 : vector<4x32xf32>
    %235 = math.exp %234 : vector<4x32xf32>
    %cst_43 = arith.constant 1.000000e+00 : f32
    %236 = vector.broadcast %cst_43 : f32 to vector<4x32xf32>
    %237 = arith.addf %236, %235 : vector<4x32xf32>
    %238 = arith.divf %236, %237 : vector<4x32xf32>
    %239 = vector.extract_strided_slice %15 {offsets = [28, 0], sizes = [4, 32], strides = [1, 1]} : vector<32x32xf32> to vector<4x32xf32>
    %240 = vector.extract_strided_slice %222 {offsets = [0, 256], sizes = [4, 32], strides = [1, 1]} : vector<4x384xf32> to vector<4x32xf32>
    %241 = vector.broadcast %17 : vector<1x32xf32> to vector<4x32xf32>
    %242 = arith.addf %240, %241 : vector<4x32xf32>
    %243 = arith.mulf %230, %242 : vector<4x32xf32>
    %244 = arith.addf %239, %243 : vector<4x32xf32>
    %245 = math.tanh %244 : vector<4x32xf32>
    %cst_44 = arith.constant 1.000000e+00 : f32
    %246 = vector.broadcast %cst_44 : f32 to vector<4x32xf32>
    %247 = arith.subf %246, %238 : vector<4x32xf32>
    %248 = arith.mulf %247, %245 : vector<4x32xf32>
    %249 = arith.mulf %238, %221 : vector<4x32xf32>
    %250 = arith.addf %248, %249 : vector<4x32xf32>
    %cst_45 = arith.constant dense<0.000000e+00> : vector<32xf32>
    %251 = vector.multi_reduction <add>, %47, %cst_45 [0] : vector<4x32xf32> to vector<32xf32>
    %252 = vector.shape_cast %251 : vector<32xf32> to vector<1x32xf32>
    %cst_46 = arith.constant dense<0.000000e+00> : vector<32xf32>
    %253 = vector.multi_reduction <add>, %76, %cst_46 [0] : vector<4x32xf32> to vector<32xf32>
    %254 = vector.shape_cast %253 : vector<32xf32> to vector<1x32xf32>
    %cst_47 = arith.constant dense<0.000000e+00> : vector<32xf32>
    %255 = vector.multi_reduction <add>, %105, %cst_47 [0] : vector<4x32xf32> to vector<32xf32>
    %256 = vector.shape_cast %255 : vector<32xf32> to vector<1x32xf32>
    %cst_48 = arith.constant dense<0.000000e+00> : vector<32xf32>
    %257 = vector.multi_reduction <add>, %134, %cst_48 [0] : vector<4x32xf32> to vector<32xf32>
    %258 = vector.shape_cast %257 : vector<32xf32> to vector<1x32xf32>
    %cst_49 = arith.constant dense<0.000000e+00> : vector<32xf32>
    %259 = vector.multi_reduction <add>, %163, %cst_49 [0] : vector<4x32xf32> to vector<32xf32>
    %260 = vector.shape_cast %259 : vector<32xf32> to vector<1x32xf32>
    %cst_50 = arith.constant dense<0.000000e+00> : vector<32xf32>
    %261 = vector.multi_reduction <add>, %192, %cst_50 [0] : vector<4x32xf32> to vector<32xf32>
    %262 = vector.shape_cast %261 : vector<32xf32> to vector<1x32xf32>
    %cst_51 = arith.constant dense<0.000000e+00> : vector<32xf32>
    %263 = vector.multi_reduction <add>, %221, %cst_51 [0] : vector<4x32xf32> to vector<32xf32>
    %264 = vector.shape_cast %263 : vector<32xf32> to vector<1x32xf32>
    %cst_52 = arith.constant dense<0.000000e+00> : vector<32xf32>
    %265 = vector.multi_reduction <add>, %250, %cst_52 [0] : vector<4x32xf32> to vector<32xf32>
    %266 = vector.shape_cast %265 : vector<32xf32> to vector<1x32xf32>
    %267 = tpu.concatenate %252, %254, %256, %258, %260, %262, %264, %266 in 0 : vector<1x32xf32>, vector<1x32xf32>, vector<1x32xf32>, vector<1x32xf32>, vector<1x32xf32>, vector<1x32xf32>, vector<1x32xf32>, vector<1x32xf32> -> vector<8x32xf32>
    %c0_53 = arith.constant 0 : index
    %c0_54 = arith.constant 0 : index
    %268 = vector.load %arg8[%c0_53, %c0_54] : memref<8x1xf32, #tpu.memory_space<vmem>>, vector<8x1xf32>
    %269 = vector.broadcast %268 : vector<8x1xf32> to vector<8x32xf32>
    %270 = arith.divf %267, %269 : vector<8x32xf32>
    %c0_55 = arith.constant 0 : index
    %c0_56 = arith.constant 0 : index
    %271 = vector.load %arg6[%c0_55, %c0_56] : memref<32x128xf32, #tpu.memory_space<vmem>>, vector<32x128xf32>
    %cst_57 = arith.constant dense<0.000000e+00> : vector<8x128xf32>
    %272 = tpu.matmul %270, %271, %cst_57 {dimension_numbers = #tpu.dot_dimension_numbers<[1], [0], [0], [1], [0, 0, 1, 1], [], []>} : vector<8x32xf32>, vector<32x128xf32>, vector<8x128xf32> -> vector<8x128xf32>
    %c0_58 = arith.constant 0 : index
    %c0_59 = arith.constant 0 : index
    %273 = vector.load %arg7[%c0_58, %c0_59] : memref<1x128xf32, #tpu.memory_space<vmem>>, vector<1x128xf32>
    %274 = vector.broadcast %273 : vector<1x128xf32> to vector<8x128xf32>
    %275 = arith.addf %272, %274 : vector<8x128xf32>
    %c0_60 = arith.constant 0 : index
    %c0_61 = arith.constant 0 : index
    %276 = vector.load %arg9[%c0_60, %c0_61] : memref<8x128xf32, #tpu.memory_space<vmem>>, vector<8x128xf32>
    tpu.vector_store %arg9[%c0_60, %c0_61], %275 {strides = array<i32>} : memref<8x128xf32, #tpu.memory_space<vmem>>, vector<8x128xf32>,
    return
  }
}

</mosaic_0001>

<bundles_post_ra>
// kernel: gru_forward.1
= control target key start
LH: loop header
LB: loop body
LE: loop exit
PB: predicated region body
PF: predicated region fallthrough
CT: control target
= control target key end

     0   :  { %14 = vsyncpa [#allocation3], 0  ;;  %s2029_s0 = inlined_call_operand.vmem [shape: s32[32,1], index: 0, kind: input, shape index: {}]   ;;  %s2030_s1 = inlined_call_operand.vmem [shape: f32[56,32], index: 1, kind: input, shape index: {}]   ;;  %s2031_s2 = inlined_call_operand.vmem [shape: f32[32,384], index: 2, kind: input, shape index: {}]   ;;  %s2032_s3 = inlined_call_operand.vmem [shape: f32[1,384], index: 3, kind: input, shape index: {}]   ;;  %s2033_s4 = inlined_call_operand.hbm [shape: f32[32,384], index: 4, kind: input, shape index: {}]   ;;  %s2034_s5 = inlined_call_operand.vmem [shape: f32[1,32], index: 5, kind: input, shape index: {}]   ;;  %s2035_s6 = inlined_call_operand.hbm [shape: f32[32,128], index: 6, kind: input, shape index: {}]   ;;  %s2036_s7 = inlined_call_operand.vmem [shape: f32[1,128], index: 7, kind: input, shape index: {}]   ;;  %s2037_s8 = inlined_call_operand.vmem [shape: f32[8,1], index: 8, kind: input, shape index: {}]   ;;  %s2038_s9 = inlined_call_operand.hbm [shape: f32[8,128], index: 9, kind: output, shape index: {}]  }
   0x1   :  { %15 = vsyncpa [#allocation6], 0 }
   0x2   :  { %16 = vsyncpa [#allocation4], 0  ;;  %s29_s11 = sshll.u32 %s2033_s4, 4  ;;  %s1596_s12 = smov [#allocation2]   ;;  %s30_s11 = int_to_ptr.hbm [resolvable:$true] %s29_s11 }
   0x3   :  { %s31_s13 = sshll.u32 %s1596_s12, 4  ;;  %s44_s16 = sshll.u32 %s2035_s6, 4  ;;  %s32_s13 = int_to_ptr.vmem [resolvable:$true] %s31_s13  ;;  %s45_s16 = int_to_ptr.hbm [resolvable:$true] %s44_s16 }
   0x4   :  { %s1597_s17 = smov 384   ;;  %s1598_s18 = smov 24  }
   0x5   :  { %37 = dma.hbm_to_vmem [thread:$0]  %s30_s11, 1536, %s32_s13, [#allocation3], %s1597_s17, %s1597_s17, %s1598_s18  }
   0x6   :  { %s1599_s19 = smov [#allocation5]   ;;  %s1600_s21 = smov 128  }
   0x7   :  { %s46_s20 = sshll.u32 %s1599_s19, 4  ;;  %s1601_s22 = smov 8   ;;  %s47_s20 = int_to_ptr.vmem [resolvable:$true] %s46_s20 }
   0x8   :  { %52 = dma.hbm_to_vmem [thread:$0]  %s45_s16, 512, %s47_s20, [#allocation6], %s1600_s21, %s1600_s21, %s1601_s22  }
   0x9   :  { %1590 = dma.done.wait [#allocation3], 1536  }
   0xa   :  { %1591 = vsyncadd [#allocation3], 4294965760 }
   0xb   :  { %1592 = dma.done.wait [#allocation6], 512  }
   0xc   :  { %1593 = vsyncadd [#allocation6], 4294966784  ;;  %v1602_v0 = vmov 0   ;;  %v65_v1 = vld [vmem:[%s2029_s0] sm:$0xff]  ;;  %v67_v2 = vld [vmem:[%s2029_s0 + $0x10] sm:$0xff]  ;;  %v69_v12 = vlaneseq  ;;  %vm102_vm0 = vcmask 457728  }
   0xd   :  { %1430 = vset.pattern.permute.xlu0 %v1602_v0  ;;  %1431 = vset.pattern.permute.xlu1 %v1602_v0  ;;  %v101_v3 = vld [vmem:[%s2030_s1 + $0x30] sm:$0xff]  ;;  %v100_v4 = vld [vmem:[%s2030_s1 + $0x28] sm:$0xff]  ;;  %v99_v5 = vld [vmem:[%s2030_s1 + $0x20] sm:$0xff]  ;;  %v1603_v24 = vmov 0.0   ;;  %vm164_vm5 = vcmask 261120   ;;  %s1604_s24 = smov [#allocation7]  }
   0xe   :  { %1432 = vset.pattern.permute.xlu2 %v1602_v0  ;;  %72 = vperm.xlu0 %1430, %v65_v1   ;;  %v98_v6 = vld [vmem:[%s2030_s1 + $0x18] sm:$0xff]  ;;  %v66_v7 = vld [vmem:[%s2029_s0 + $0x8] sm:$0xff]  ;;  %v97_v9 = vld [vmem:[%s2030_s1 + $0x10] sm:$0xff]  ;;  %v70_v19 = vand.u32 127, %v69_v12  ;;  %s1350_s25 = sshll.u32 %s1604_s24, 4  ;;  %s1352_s27 = sshll.u32 %s2038_s9, 4  ;;  %s1351_s25 = int_to_ptr.vmem [resolvable:$true] %s1350_s25  ;;  %s1353_s27 = int_to_ptr.hbm [resolvable:$true] %s1352_s27 }
   0xf   :  { %78 = vperm.xlu1 %1431, %v67_v2   ;;  %124 = vmatpush.msra.mxu0 %v101_v3  ;;  %v68_v8 = vld [vmem:[%s2029_s0 + $0x18] sm:$0xff]  ;;  %v96_v10 = vld [vmem:[%s2030_s1 + $0x8] sm:$0xff]  ;;  %v95_v11 = vld [vmem:[%s2030_s1] sm:$0xff] }
  0x10   :  { %v153_v13 = vld [vmem:[%s2031_s2 + $0x48] sm:$0xff]  ;;  %v154_v14 = vld [vmem:[%s2031_s2 + $0x50] sm:$0xff]  ;;  %v155_v15 = vld [vmem:[%s2031_s2 + $0x58] sm:$0xff] }
  0x11   :  { %125 = vmatpush.msra.mxu0 %v100_v4  ;;  %189 = vmatpush.msra.mxu1 %v153_v13  ;;  %v150_v16 = vld [vmem:[%s2031_s2 + $0x30] sm:$0xff]  ;;  %v151_v17 = vld [vmem:[%s2031_s2 + $0x38] sm:$0xff]  ;;  %v152_v18 = vld [vmem:[%s2031_s2 + $0x40] sm:$0xff] }
  0x12   :  { %218 = vmatpush.msra.mxu2 %v154_v14  ;;  %247 = vmatpush.msra.mxu3 %v155_v15  ;;  %v147_v20 = vld [vmem:[%s2031_s2 + $0x18] sm:$0xff]  ;;  %v148_v21 = vld [vmem:[%s2031_s2 + $0x20] sm:$0xff]  ;;  %v149_v22 = vld [vmem:[%s2031_s2 + $0x28] sm:$0xff] }
  0x13   :  { %126 = vmatpush.msra.mxu0 %v99_v5  ;;  %190 = vmatpush.msra.mxu1 %v150_v16  ;;  %v144_v32 = vld [vmem:[%s2031_s2] sm:$0xff]  ;;  %v145_v33 = vld [vmem:[%s2031_s2 + $0x8] sm:$0xff]  ;;  %v146_v34 = vld [vmem:[%s2031_s2 + $0x10] sm:$0xff] }
  0x14   :  { %219 = vmatpush.msra.mxu2 %v151_v17  ;;  %248 = vmatpush.msra.mxu3 %v152_v18  ;;  %v1738_v35 = vld [vmem:[#allocation2 + $0x48] sm:$0xff]  ;;  %v1740_v36 = vld [vmem:[#allocation2 + $0x50] sm:$0xff]  ;;  %v1747_v38 = vld [vmem:[#allocation2 + $0x38] sm:$0xff] }
  0x15   :  { %127 = vmatpush.msra.mxu0 %v98_v6  ;;  %191 = vmatpush.msra.mxu1 %v147_v20  ;;  %v1745_v37 = vld [vmem:[#allocation2 + $0x30] sm:$0xff]  ;;  %v1752_v39 = vld [vmem:[#allocation2 + $0x18] sm:$0xff]  ;;  %v1754_v40 = vld [vmem:[#allocation2 + $0x20] sm:$0xff] }
  0x16   :  { %75 = vperm.xlu0 %1430, %v66_v7   ;;  %220 = vmatpush.msra.mxu2 %v148_v21  ;;  %v1756_v41 = vld [vmem:[#allocation2 + $0x58] sm:$0xff]  ;;  %v1762_v42 = vld [vmem:[#allocation2] sm:$0xff]  ;;  %v1764_v43 = vld [vmem:[#allocation2 + $0x8] sm:$0xff] }
  0x17   :  { %81 = vperm.xlu1 %1431, %v68_v8   ;;  %128 = vmatpush.msra.mxu0 %v97_v9  ;;  %v1766_v44 = vld [vmem:[#allocation2 + $0x40] sm:$0xff]  ;;  %v1776_v46 = vld [vmem:[#allocation2 + $0x28] sm:$0xff]  ;;  %v1779_v47 = vld [vmem:[#allocation2 + $0x10] sm:$0xff] }
  0x18   :  { %249 = vmatpush.msra.mxu3 %v149_v22  ;;  %192 = vmatpush.msra.mxu1 %v144_v32  ;;  %v156_v52 = vld [vmem:[%s2032_s3] sm:$0x7] }
  0x19   :  { %129 = vmatpush.msra.mxu0 %v96_v10  ;;  %221 = vmatpush.msra.mxu2 %v145_v33  ;;  %v158_v54 = vperm.slane %v156_v52, 0  ;;  %v159_v58 = vperm.slane %v156_v52, 1  ;;  %v160_v59 = vperm.slane %v156_v52, 2 }
  0x1a   :  { %250 = vmatpush.msra.mxu3 %v146_v34  ;;  %292 = vmatpush.msrb.mxu1 %v1738_v35 }
  0x1b   :  { %130 = vmatpush.msra.mxu0 %v95_v11  ;;  %312 = vmatpush.msrb.mxu2 %v1740_v36 }
  0x1c   :  { %293 = vmatpush.msrb.mxu1 %v1745_v37  ;;  %332 = vmatpush.msrb.mxu3 %v1756_v41 }
  0x1d   :  { %406 = vmatpush.msrb.mxu0 %v1738_v35  ;;  %313 = vmatpush.msrb.mxu2 %v1747_v38 }
  0x1e   :  { %294 = vmatpush.msrb.mxu1 %v1752_v39  ;;  %333 = vmatpush.msrb.mxu3 %v1766_v44 }
  0x1f   :  { %407 = vmatpush.msrb.mxu0 %v1745_v37  ;;  %314 = vmatpush.msrb.mxu2 %v1754_v40 }
  0x20   :  { %295 = vmatpush.msrb.mxu1 %v1762_v42  ;;  %334 = vmatpush.msrb.mxu3 %v1776_v46 }
  0x21   :  { %408 = vmatpush.msrb.mxu0 %v1752_v39  ;;  %315 = vmatpush.msrb.mxu2 %v1764_v43 }
  0x22   :  { %335 = vmatpush.msrb.mxu3 %v1779_v47 }
  0x23   :  { %409 = vmatpush.msrb.mxu0 %v1762_v42 }
  0x80   :  { %v73_v23 = vpop.permute.xlu0 %72 }
  0x81   :  { %vm83_vm1 = vcmp.eq.s32.totalorder %v70_v19, %v73_v23  ;;  %v79_v27 = vpop.permute.xlu1 %78 }
  0x82   :  { %v1363_v25 = vsel %vm83_vm1, 1.0, %v1603_v24  ;;  %vm85_vm3 = vcmp.eq.s32.totalorder %v70_v19, %v79_v27  ;;  %v1851_v27 = vld [vmem:[%s2034_s5] ss:$0 sm:$0xff] }
  0x83   :  { %1367 = vmatmul.msk.f32.vlgmr.msra.gmra.mxu0 %vm102_vm0, %v1363_v25  ;;  %v1365_v29 = vsel %vm85_vm3, 1.0, %v1603_v24 }
  0x84   :  { %549 = vmatpush.msra.mxu0 %v1740_v36 }
  0x86   :  { %550 = vmatpush.msra.mxu0 %v1747_v38 }
  0x88   :  { %v76_v26 = vpop.permute.xlu0 %75  ;;  %551 = vmatpush.msra.mxu0 %v1754_v40 }
  0x89   :  { %vm84_vm2 = vcmp.eq.s32.totalorder %v70_v19, %v76_v26  ;;  %v82_v30 = vpop.permute.xlu1 %81 }
  0x8a   :  { %v1364_v28 = vsel %vm84_vm2, 1.0, %v1603_v24  ;;  %vm86_vm4 = vcmp.eq.s32.totalorder %v70_v19, %v82_v30  ;;  %552 = vmatpush.msra.mxu0 %v1764_v43 }
  0x8b   :  { %1368 = vmatmul.msk.f32.gmra.mxu0 %vm102_vm0, %v1364_v28  ;;  %v1366_v31 = vsel %vm86_vm4, 1.0, %v1603_v24 }
  0x93   :  { %1369 = vmatmul.msk.f32.gmra.mxu0 %vm102_vm0, %v1365_v29 }
  0x9b   :  { %1370 = vmatmul.msk.f32.gmra.mxu0 %vm102_vm0, %v1366_v31 }
 0x100   :  { %v132_v45 = vpop.f32.mrf.mxu0 }
 0x101   :  { %1371 = vmatmul.msk.f32.vlgmr.msra.gmra.mxu1 %vm164_vm5, %v132_v45  ;;  %1375 = vmatmul.msk.f32.vlgmr.msra.gmra.mxu2 %vm164_vm5, %v132_v45 }
 0x102   :  { %1379 = vmatmul.msk.f32.vlgmr.msra.gmra.mxu3 %vm164_vm5, %v132_v45  ;;  %426 = vmatpush.msra.mxu1 %v1740_v36 }
 0x103   :  { %446 = vmatpush.msra.mxu2 %v1756_v41  ;;  %529 = vmatpush.msra.mxu3 %v1738_v35 }
 0x104   :  { %427 = vmatpush.msra.mxu1 %v1747_v38 }
 0x105   :  { %447 = vmatpush.msra.mxu2 %v1766_v44  ;;  %530 = vmatpush.msra.mxu3 %v1745_v37 }
 0x106   :  { %428 = vmatpush.msra.mxu1 %v1754_v40 }
 0x107   :  { %448 = vmatpush.msra.mxu2 %v1776_v46  ;;  %531 = vmatpush.msra.mxu3 %v1752_v39 }
 0x108   :  { %v135_v48 = vpop.f32.mrf.mxu0  ;;  %429 = vmatpush.msra.mxu1 %v1764_v43 }
 0x109   :  { %1372 = vmatmul.msk.f32.gmra.mxu1 %vm164_vm5, %v135_v48  ;;  %1376 = vmatmul.msk.f32.gmra.mxu2 %vm164_vm5, %v135_v48 }
 0x10a   :  { %1380 = vmatmul.msk.f32.gmra.mxu3 %vm164_vm5, %v135_v48  ;;  %449 = vmatpush.msra.mxu2 %v1779_v47 }
 0x10b   :  { %532 = vmatpush.msra.mxu3 %v1762_v42 }
 0x110   :  { %v138_v49 = vpop.f32.mrf.mxu0 }
 0x111   :  { %1373 = vmatmul.msk.f32.gmra.mxu1 %vm164_vm5, %v138_v49  ;;  %1377 = vmatmul.msk.f32.gmra.mxu2 %vm164_vm5, %v138_v49 }
 0x112   :  { %1381 = vmatmul.msk.f32.gmra.mxu3 %vm164_vm5, %v138_v49 }
 0x118   :  { %v141_v50 = vpop.f32.mrf.mxu0 }
 0x119   :  { %1374 = vmatmul.msk.f32.gmra.mxu1 %vm164_vm5, %v141_v50  ;;  %1378 = vmatmul.msk.f32.gmra.mxu2 %vm164_vm5, %v141_v50 }
 0x11a   :  { %1382 = vmatmul.msk.f32.gmra.mxu3 %vm164_vm5, %v141_v50 }
 0x121   :  { %296 = vmatmul.f32.vlgmr.msrb.gmra.mxu1 %v1603_v24  ;;  %316 = vmatmul.f32.vlgmr.msrb.gmra.mxu2 %v1603_v24 }
 0x122   :  { %336 = vmatmul.f32.vlgmr.msrb.gmra.mxu3 %v1603_v24  ;;  %569 = vmatpush.msrb.mxu1 %v1756_v41 }
 0x123   :  { %641 = vmatpush.msrb.mxu2 %v1738_v35  ;;  %661 = vmatpush.msrb.mxu3 %v1740_v36 }
 0x124   :  { %570 = vmatpush.msrb.mxu1 %v1766_v44 }
 0x125   :  { %642 = vmatpush.msrb.mxu2 %v1745_v37  ;;  %662 = vmatpush.msrb.mxu3 %v1747_v38 }
 0x126   :  { %571 = vmatpush.msrb.mxu1 %v1776_v46 }
 0x127   :  { %643 = vmatpush.msrb.mxu2 %v1752_v39  ;;  %663 = vmatpush.msrb.mxu3 %v1754_v40 }
 0x128   :  { %572 = vmatpush.msrb.mxu1 %v1779_v47 }
 0x129   :  { %644 = vmatpush.msrb.mxu2 %v1762_v42  ;;  %664 = vmatpush.msrb.mxu3 %v1764_v43 }
 0x17e   :  { %v194_v51 = vpop.f32.mrf.mxu1 }
 0x17f   :  { %v1838_v9 = vadd.f32 %v194_v51, %v158_v54 }
 0x184   :  { %v223_v53 = vpop.f32.mrf.mxu2 }
 0x185   :  { %v252_v55 = vpop.f32.mrf.mxu3  ;;  %v1845_v16 = vadd.f32 %v223_v53, %v159_v58 }
 0x186   :  { %v197_v56 = vpop.f32.mrf.mxu1  ;;  %v1854_v51 = vadd.f32 %v252_v55, %v160_v59 }
 0x187   :  { %v1824_v57 = vadd.f32 %v197_v56, %v158_v54 }
 0x18c   :  { %v226_v60 = vpop.f32.mrf.mxu2 }
 0x18d   :  { %v1826_v61 = vadd.f32 %v226_v60, %v159_v58  ;;  %v255_v62 = vpop.f32.mrf.mxu3 }
 0x18e   :  { %v1828_v63 = vadd.f32 %v255_v62, %v160_v59  ;;  %v200_v0 = vpop.f32.mrf.mxu1 }
 0x18f   :  { %v1830_v1 = vadd.f32 %v200_v0, %v158_v54 }
 0x194   :  { %v229_v2 = vpop.f32.mrf.mxu2 }
 0x195   :  { %v1832_v3 = vadd.f32 %v229_v2, %v159_v58  ;;  %v258_v4 = vpop.f32.mrf.mxu3 }
 0x196   :  { %v1834_v5 = vadd.f32 %v258_v4, %v160_v59  ;;  %v203_v6 = vpop.f32.mrf.mxu1 }
 0x197   :  { %v1836_v7 = vadd.f32 %v203_v6, %v158_v54 }
 0x19c   :  { %v232_v8 = vpop.f32.mrf.mxu2 }
 0x19d   :  { %v1840_v10 = vadd.f32 %v232_v8, %v159_v58  ;;  %v261_v11 = vpop.f32.mrf.mxu3 }
 0x19e   :  { %v1842_v12 = vadd.f32 %v261_v11, %v160_v59  ;;  %v297_v13 = vpop.f32.mrf.mxu1 }
 0x19f   :  { %v340_v14 = vadd.f32 %v297_v13, %v1838_v9 }
 0x1a1   :  { %v1383_v15 = vmul.f32 -1.442695, %v340_v14 }
 0x1a3   :  { %1435 = vpow2.f32 %v1383_v15 }
 0x1a4   :  { %v317_v17 = vpop.f32.mrf.mxu2 }
 0x1a5   :  { %v360_v18 = vadd.f32 %v317_v17, %v1845_v16  ;;  %v337_v28 = vpop.f32.mrf.mxu3 }
 0x1a6   :  { %v383_v45 = vadd.f32 %v1851_v27, %v337_v28 }
 0x1a7   :  { %v1384_v19 = vmul.f32 -1.442695, %v360_v18 }
 0x1a9   :  { %v1436_v20 = vpop.eup %1435  ;;  %1437 = vpow2.f32 %v1384_v19 }
 0x1aa   :  { %v344_v21 = vadd.f32 1.0, %v1436_v20 }
 0x1ac   :  { %1439 = vrcp.f32 %v344_v21  ;;  %v356_v29 = vand.u32 2147483648, %v344_v21  ;;  %v354_v31 = vand.u32 2147483647, %v344_v21  ;;  %vm350_vm7 = vweird.f32 %v344_v21 }
 0x1ae   :  { %v357_v48 = vor.u32 1.1754944e-38, %v356_v29  ;;  %vm355_vm9 = vcmp.eq.f32.partialorder %v354_v31, 8.507059e+37 }
 0x1af   :  { %v1438_v22 = vpop.eup %1437 }
 0x1b0   :  { %v364_v23 = vadd.f32 1.0, %v1438_v22 }
 0x1b2   :  { %v1440_v24 = vpop.eup %1439  ;;  %1441 = vrcp.f32 %v364_v23  ;;  %v376_v54 = vand.u32 2147483648, %v364_v23  ;;  %v374_v58 = vand.u32 2147483647, %v364_v23  ;;  %vm370_vm11 = vweird.f32 %v364_v23 }
 0x1b3   :  { %v346_v25 = vmul.f32 %v1440_v24, %v344_v21  ;;  %vm351_vm6 = vweird.f32 %v1440_v24 }
 0x1b4   :  { %vm352_vm8 = vmor %vm350_vm7, %vm351_vm6  ;;  %v377_v0 = vor.u32 1.1754944e-38, %v376_v54  ;;  %vm375_vm13 = vcmp.eq.f32.partialorder %v374_v58, 8.507059e+37 }
 0x1b5   :  { %v347_v26 = vsub.f32 1.0, %v346_v25 }
 0x1b7   :  { %v348_v30 = vmul.f32 %v1440_v24, %v347_v26 }
 0x1b8   :  { %v1442_v32 = vpop.eup %1441 }
 0x1b9   :  { %v366_v33 = vmul.f32 %v1442_v32, %v364_v23  ;;  %v349_v34 = vadd.f32 %v1440_v24, %v348_v30  ;;  %vm371_vm10 = vweird.f32 %v1442_v32 }
 0x1ba   :  { %vm372_vm12 = vmor %vm370_vm11, %vm371_vm10  ;;  %vm1218_vm11 = vcmask 257024  }
 0x1bb   :  { %v367_v49 = vsub.f32 1.0, %v366_v33  ;;  %v353_v50 = vsel %vm352_vm8, %v1440_v24, %v349_v34 }
 0x1bc   :  { %v358_v52 = vsel %vm355_vm9, %v357_v48, %v353_v50 }
 0x1bd   :  { %v368_v53 = vmul.f32 %v1442_v32, %v367_v49  ;;  %v384_v56 = vmul.f32 %v383_v45, %v358_v52 }
 0x1bf   :  { %v369_v60 = vadd.f32 %v1442_v32, %v368_v53  ;;  %v385_v62 = vadd.f32 %v384_v56, %v1854_v51 }
 0x1c1   :  { %v373_v2 = vsel %vm372_vm12, %v1442_v32, %v369_v60  ;;  %1443 = vtanh.f32 %v385_v62 }
 0x1c2   :  { %v378_v4 = vsel %vm375_vm13, %v377_v0, %v373_v2 }
 0x1c3   :  { %v387_v6 = vsub.f32 1.0, %v378_v4  ;;  %v389_v59 = vmul.f32 0.0, %v378_v4 }
 0x1c7   :  { %v1444_v8 = vpop.eup %1443 }
 0x1c8   :  { %v388_v55 = vmul.f32 %v1444_v8, %v387_v6 }
 0x1ca   :  { %v1857_v11 = vadd.f32 %v389_v59, %v388_v55 }
 0x1cc   :  { %1385 = vmatmul.msk.f32.vlgmr.msrb.gmra.mxu0 %vm164_vm5, %v1857_v11  ;;  %1386 = vmatmul.msk.f32.vlgmr.msra.gmra.mxu1 %vm164_vm5, %v1857_v11  ;;  %v509_v55 = vrot.slane %v1857_v11, 4 }
 0x1cd   :  { %1387 = vmatmul.msk.f32.vlgmr.msra.gmra.mxu2 %vm164_vm5, %v1857_v11  ;;  %681 = vmatpush.msrb.mxu0 %v1756_v41 }
 0x1ce   :  { %764 = vmatpush.msra.mxu1 %v1738_v35  ;;  %784 = vmatpush.msra.mxu2 %v1740_v36 }
 0x1cf   :  { %682 = vmatpush.msrb.mxu0 %v1766_v44 }
 0x1d0   :  { %765 = vmatpush.msra.mxu1 %v1745_v37  ;;  %785 = vmatpush.msra.mxu2 %v1747_v38 }
 0x1d1   :  { %683 = vmatpush.msrb.mxu0 %v1776_v46 }
 0x1d2   :  { %766 = vmatpush.msra.mxu1 %v1752_v39  ;;  %786 = vmatpush.msra.mxu2 %v1754_v40 }
 0x1d3   :  { %684 = vmatpush.msrb.mxu0 %v1779_v47 }
 0x1d4   :  { %767 = vmatpush.msra.mxu1 %v1762_v42  ;;  %787 = vmatpush.msra.mxu2 %v1764_v43 }
 0x249   :  { %v411_v13 = vpop.f32.mrf.mxu0  ;;  %v431_v14 = vpop.f32.mrf.mxu1 }
 0x24a   :  { %v455_v15 = vrot.slane %v411_v13, 4  ;;  %v478_v17 = vrot.slane %v431_v14, 4 }
 0x24c   :  { %v457_v18 = vadd.f32 %v455_v15, %v1838_v9  ;;  %v480_v19 = vadd.f32 %v478_v17, %v1845_v16 }
 0x24e   :  { %v1388_v20 = vmul.f32 -1.442695, %v457_v18  ;;  %v1389_v21 = vmul.f32 -1.442695, %v480_v19 }
 0x250   :  { %1445 = vpow2.f32 %v1388_v20  ;;  %v451_v31 = vpop.f32.mrf.mxu2 }
 0x251   :  { %1447 = vpow2.f32 %v1389_v21  ;;  %v500_v45 = vadd.f32 %v1851_v27, %v451_v31 }
 0x253   :  { %v502_v53 = vrot.slane %v500_v45, 4 }
 0x256   :  { %v1446_v22 = vpop.eup %1445 }
 0x257   :  { %v1448_v23 = vpop.eup %1447  ;;  %v461_v24 = vadd.f32 1.0, %v1446_v22 }
 0x258   :  { %v484_v25 = vadd.f32 1.0, %v1448_v23 }
 0x259   :  { %1449 = vrcp.f32 %v461_v24  ;;  %v473_v9 = vand.u32 2147483648, %v461_v24  ;;  %v471_v16 = vand.u32 2147483647, %v461_v24  ;;  %vm467_vm15 = vweird.f32 %v461_v24 }
 0x25a   :  { %1451 = vrcp.f32 %v484_v25  ;;  %v496_v58 = vand.u32 2147483648, %v484_v25  ;;  %vm490_vm3 = vweird.f32 %v484_v25  ;;  %v494_v62 = vand.u32 2147483647, %v484_v25 }
 0x25b   :  { %v474_v50 = vor.u32 1.1754944e-38, %v473_v9  ;;  %vm472_vm1 = vcmp.eq.f32.partialorder %v471_v16, 8.507059e+37 }
 0x25c   :  { %v497_v4 = vor.u32 1.1754944e-38, %v496_v58  ;;  %vm495_vm6 = vcmp.eq.f32.partialorder %v494_v62, 8.507059e+37 }
 0x25f   :  { %v1450_v26 = vpop.eup %1449 }
 0x260   :  { %v1452_v28 = vpop.eup %1451  ;;  %v463_v29 = vmul.f32 %v1450_v26, %v461_v24  ;;  %vm468_vm14 = vweird.f32 %v1450_v26 }
 0x261   :  { %v486_v30 = vmul.f32 %v1452_v28, %v484_v25  ;;  %vm469_vm0 = vmor %vm467_vm15, %vm468_vm14  ;;  %vm491_vm2 = vweird.f32 %v1452_v28 }
 0x262   :  { %v464_v32 = vsub.f32 1.0, %v463_v29  ;;  %vm492_vm4 = vmor %vm490_vm3, %vm491_vm2 }
 0x263   :  { %v487_v33 = vsub.f32 1.0, %v486_v30 }
 0x264   :  { %v465_v34 = vmul.f32 %v1450_v26, %v464_v32 }
 0x265   :  { %v488_v48 = vmul.f32 %v1452_v28, %v487_v33 }
 0x266   :  { %v466_v49 = vadd.f32 %v1450_v26, %v465_v34 }
 0x267   :  { %v489_v56 = vadd.f32 %v1452_v28, %v488_v48 }
 0x268   :  { %v470_v52 = vsel %vm469_vm0, %v1450_v26, %v466_v49  ;;  %vm1278_vm0 = vcmask 1040384  }
 0x269   :  { %v475_v54 = vsel %vm472_vm1, %v474_v50, %v470_v52  ;;  %v493_v2 = vsel %vm492_vm4, %v1452_v28, %v489_v56  ;;  %vm1280_vm1 = vcmask 1041408  }
 0x26a   :  { %v504_v60 = vmul.f32 %v502_v53, %v475_v54  ;;  %v498_v6 = vsel %vm495_vm6, %v497_v4, %v493_v2  ;;  %v1219_v2 = vsel %vm1218_vm11, %v1857_v11, 0.0 }
 0x26b   :  { %v507_v8 = vsub.f32 1.0, %v498_v6  ;;  %v511_v14 = vmul.f32 %v509_v55, %v498_v6 }
 0x26c   :  { %v505_v0 = vadd.f32 %v504_v60, %v1854_v51 }
 0x26e   :  { %1453 = vtanh.f32 %v505_v0 }
 0x274   :  { %v1454_v59 = vpop.eup %1453 }
 0x275   :  { %v508_v13 = vmul.f32 %v1454_v59, %v507_v8  ;;  %v1220_v59 = vrot.slane %v1219_v2, 4 }
 0x277   :  { %v512_v15 = vadd.f32 %v511_v14, %v508_v13 }
 0x279   :  { %v1882_v17 = vrot.slane %v512_v15, 4  ;;  %v1221_v15 = vadd.f32 %v1220_v59, %v1219_v2 }
 0x27b   :  { %1390 = vmatmul.msk.f32.vlgmr.msra.gmra.mxu3 %vm164_vm5, %v1882_v17  ;;  %1391 = vmatmul.msk.f32.vlgmr.msra.gmra.mxu0 %vm164_vm5, %v1882_v17  ;;  %v1226_v58 = vsel %vm1218_vm11, %v1882_v17, 0.0 }
 0x27c   :  { %1392 = vmatmul.msk.f32.vlgmr.msrb.gmra.mxu1 %vm164_vm5, %v1882_v17  ;;  %804 = vmatpush.msra.mxu3 %v1756_v41  ;;  %v1227_v6 = vrot.slane %v1226_v58, 4 }
 0x27d   :  { %876 = vmatpush.msra.mxu0 %v1738_v35  ;;  %896 = vmatpush.msrb.mxu1 %v1740_v36 }
 0x27e   :  { %805 = vmatpush.msra.mxu3 %v1766_v44  ;;  %v1228_v14 = vadd.f32 %v1227_v6, %v1226_v58 }
 0x27f   :  { %877 = vmatpush.msra.mxu0 %v1745_v37  ;;  %897 = vmatpush.msrb.mxu1 %v1747_v38 }
 0x280   :  { %806 = vmatpush.msra.mxu3 %v1776_v46 }
 0x281   :  { %878 = vmatpush.msra.mxu0 %v1752_v39  ;;  %898 = vmatpush.msrb.mxu1 %v1754_v40 }
 0x282   :  { %807 = vmatpush.msra.mxu3 %v1779_v47 }
 0x283   :  { %879 = vmatpush.msra.mxu0 %v1762_v42  ;;  %899 = vmatpush.msrb.mxu1 %v1764_v43 }
 0x2f8   :  { %v554_v51 = vpop.f32.mrf.mxu0 }
 0x2f9   :  { %v597_v18 = vadd.f32 %v554_v51, %v1826_v61  ;;  %v574_v48 = vpop.f32.mrf.mxu1 }
 0x2fa   :  { %v617_v52 = vadd.f32 %v1851_v27, %v574_v48 }
 0x2fb   :  { %v1394_v19 = vmul.f32 -1.442695, %v597_v18 }
 0x2fd   :  { %1455 = vpow2.f32 %v1394_v19  ;;  %v1229_v19 = vrot.slane %v1228_v14, 2 }
 0x2fe   :  { %v534_v20 = vpop.f32.mrf.mxu3 }
 0x2ff   :  { %v577_v21 = vadd.f32 %v534_v20, %v1824_v57 }
 0x301   :  { %v1393_v22 = vmul.f32 -1.442695, %v577_v21 }
 0x303   :  { %v1456_v23 = vpop.eup %1455  ;;  %1457 = vpow2.f32 %v1393_v22  ;;  %v1222_v22 = vrot.slane %v1221_v15, 2 }
 0x304   :  { %v601_v24 = vadd.f32 1.0, %v1456_v23  ;;  %v1230_v23 = vadd.f32 %v1229_v19, %v1228_v14 }
 0x306   :  { %1459 = vrcp.f32 %v601_v24  ;;  %v613_v60 = vand.u32 2147483648, %v601_v24  ;;  %vm607_vm13 = vweird.f32 %v601_v24  ;;  %v611_v0 = vand.u32 2147483647, %v601_v24 }
 0x308   :  { %v614_v55 = vor.u32 1.1754944e-38, %v613_v60  ;;  %vm612_vm15 = vcmp.eq.f32.partialorder %v611_v0, 8.507059e+37 }
 0x309   :  { %v1458_v25 = vpop.eup %1457 }
 0x30a   :  { %v581_v26 = vadd.f32 1.0, %v1458_v25 }
 0x30c   :  { %1461 = vrcp.f32 %v581_v26  ;;  %v1460_v28 = vpop.eup %1459  ;;  %v593_v9 = vand.u32 2147483648, %v581_v26  ;;  %v591_v16 = vand.u32 2147483647, %v581_v26  ;;  %vm587_vm8 = vweird.f32 %v581_v26 }
 0x30d   :  { %v603_v29 = vmul.f32 %v1460_v28, %v601_v24  ;;  %vm608_vm12 = vweird.f32 %v1460_v28 }
 0x30e   :  { %v594_v50 = vor.u32 1.1754944e-38, %v593_v9  ;;  %vm592_vm10 = vcmp.eq.f32.partialorder %v591_v16, 8.507059e+37  ;;  %vm609_vm14 = vmor %vm607_vm13, %vm608_vm12 }
 0x30f   :  { %v604_v32 = vsub.f32 1.0, %v603_v29 }
 0x311   :  { %v605_v45 = vmul.f32 %v1460_v28, %v604_v32 }
 0x312   :  { %v1462_v30 = vpop.eup %1461 }
 0x313   :  { %v583_v31 = vmul.f32 %v1462_v30, %v581_v26  ;;  %vm588_vm7 = vweird.f32 %v1462_v30  ;;  %v606_v54 = vadd.f32 %v1460_v28, %v605_v45 }
 0x314   :  { %vm589_vm9 = vmor %vm587_vm8, %vm588_vm7 }
 0x315   :  { %v584_v33 = vsub.f32 1.0, %v583_v31  ;;  %v610_v8 = vsel %vm609_vm14, %v1460_v28, %v606_v54  ;;  %v1231_v28 = vrot.slane %v1230_v23, 1 }
 0x316   :  { %v615_v13 = vsel %vm612_vm15, %v614_v55, %v610_v8 }
 0x317   :  { %v585_v34 = vmul.f32 %v1462_v30, %v584_v33  ;;  %v621_v51 = vsub.f32 1.0, %v615_v13  ;;  %v624_v21 = vmul.f32 %v615_v13, %v1882_v17  ;;  %v1223_v17 = vadd.f32 %v1222_v22, %v1221_v15 }
 0x318   :  { %v1232_v32 = vadd.f32 %v1231_v28, %v1230_v23 }
 0x319   :  { %v586_v49 = vadd.f32 %v1462_v30, %v585_v34 }
 0x31b   :  { %v590_v53 = vsel %vm589_vm9, %v1462_v30, %v586_v49  ;;  %v1224_v30 = vrot.slane %v1223_v17, 1 }
 0x31c   :  { %v595_v56 = vsel %vm592_vm10, %v594_v50, %v590_v53 }
 0x31d   :  { %v618_v62 = vmul.f32 %v617_v52, %v595_v56  ;;  %v1225_v9 = vadd.f32 %v1224_v30, %v1223_v17 }
 0x31f   :  { %v619_v4 = vadd.f32 %v618_v62, %v1828_v63  ;;  %v1279_v16 = vsel %vm1278_vm0, %v1225_v9, %v1232_v32 }
 0x321   :  { %1463 = vtanh.f32 %v619_v4 }
 0x327   :  { %v1464_v18 = vpop.eup %1463 }
 0x328   :  { %v622_v20 = vmul.f32 %v1464_v18, %v621_v51 }
 0x32a   :  { %v1911_v11 = vadd.f32 %v624_v21, %v622_v20 }
 0x32c   :  { %1395 = vmatmul.msk.f32.vlgmr.msrb.gmra.mxu2 %vm164_vm5, %v1911_v11  ;;  %v1233_v24 = vsel %vm1218_vm11, %v1911_v11, 0.0  ;;  %1396 = vmatmul.msk.f32.vlgmr.msrb.gmra.mxu3 %vm164_vm5, %v1911_v11 }
 0x32d   :  { %v1234_v25 = vrot.slane %v1233_v24, 4  ;;  %1397 = vmatmul.msk.f32.vlgmr.msrb.gmra.mxu0 %vm164_vm5, %v1911_v11  ;;  %916 = vmatpush.msrb.mxu2 %v1756_v41 }
 0x32e   :  { %999 = vmatpush.msrb.mxu3 %v1738_v35  ;;  %1019 = vmatpush.msrb.mxu0 %v1740_v36 }
 0x32f   :  { %v1235_v26 = vadd.f32 %v1234_v25, %v1233_v24  ;;  %917 = vmatpush.msrb.mxu2 %v1766_v44 }
 0x330   :  { %1000 = vmatpush.msrb.mxu3 %v1745_v37  ;;  %1020 = vmatpush.msrb.mxu0 %v1747_v38 }
 0x331   :  { %v1236_v29 = vrot.slane %v1235_v26, 2  ;;  %918 = vmatpush.msrb.mxu2 %v1776_v46 }
 0x332   :  { %1001 = vmatpush.msrb.mxu3 %v1752_v39  ;;  %1021 = vmatpush.msrb.mxu0 %v1754_v40 }
 0x333   :  { %v1237_v31 = vadd.f32 %v1236_v29, %v1235_v26  ;;  %919 = vmatpush.msrb.mxu2 %v1779_v47 }
 0x334   :  { %1002 = vmatpush.msrb.mxu3 %v1762_v42  ;;  %1022 = vmatpush.msrb.mxu0 %v1764_v43 }
 0x335   :  { %v1238_v33 = vrot.slane %v1237_v31, 1 }
 0x337   :  { %v1239_v34 = vadd.f32 %v1238_v33, %v1237_v31  ;;  %v744_v33 = vrot.slane %v1911_v11, 4 }
 0x339   :  { %v1933_v45 = vsel %vm1280_vm1, %v1279_v16, %v1239_v34 }
 0x3aa   :  { %v686_v55 = vpop.f32.mrf.mxu0 }
 0x3af   :  { %v646_v48 = vpop.f32.mrf.mxu2  ;;  %v666_v49 = vpop.f32.mrf.mxu3 }
 0x3b0   :  { %v690_v50 = vrot.slane %v646_v48, 4  ;;  %v713_v52 = vrot.slane %v666_v49, 4 }
 0x3b2   :  { %v692_v53 = vadd.f32 %v690_v50, %v1824_v57  ;;  %v715_v54 = vadd.f32 %v713_v52, %v1826_v61  ;;  %v735_v61 = vadd.f32 %v1851_v27, %v686_v55 }
 0x3b4   :  { %v1398_v56 = vmul.f32 -1.442695, %v692_v53  ;;  %v1399_v58 = vmul.f32 -1.442695, %v715_v54  ;;  %v737_v21 = vrot.slane %v735_v61, 4 }
 0x3b6   :  { %1465 = vpow2.f32 %v1398_v56 }
 0x3b7   :  { %1467 = vpow2.f32 %v1399_v58 }
 0x3bc   :  { %v1466_v60 = vpop.eup %1465 }
 0x3bd   :  { %v1468_v62 = vpop.eup %1467  ;;  %v696_v0 = vadd.f32 1.0, %v1466_v60 }
 0x3be   :  { %v719_v2 = vadd.f32 1.0, %v1468_v62 }
 0x3bf   :  { %1469 = vrcp.f32 %v696_v0  ;;  %v708_v14 = vand.u32 2147483648, %v696_v0  ;;  %v706_v51 = vand.u32 2147483647, %v696_v0  ;;  %vm702_vm3 = vweird.f32 %v696_v0 }
 0x3c0   :  { %1471 = vrcp.f32 %v719_v2  ;;  %v731_v17 = vand.u32 2147483648, %v719_v2  ;;  %vm725_vm8 = vweird.f32 %v719_v2  ;;  %v729_v26 = vand.u32 2147483647, %v719_v2 }
 0x3c1   :  { %v709_v20 = vor.u32 1.1754944e-38, %v708_v14  ;;  %vm707_vm6 = vcmp.eq.f32.partialorder %v706_v51, 8.507059e+37 }
 0x3c2   :  { %v732_v30 = vor.u32 1.1754944e-38, %v731_v17  ;;  %vm730_vm10 = vcmp.eq.f32.partialorder %v729_v26, 8.507059e+37 }
 0x3c5   :  { %v1470_v4 = vpop.eup %1469 }
 0x3c6   :  { %v1472_v6 = vpop.eup %1471  ;;  %v698_v8 = vmul.f32 %v1470_v4, %v696_v0  ;;  %vm703_vm2 = vweird.f32 %v1470_v4 }
 0x3c7   :  { %v721_v59 = vmul.f32 %v1472_v6, %v719_v2  ;;  %vm704_vm4 = vmor %vm702_vm3, %vm703_vm2  ;;  %vm726_vm7 = vweird.f32 %v1472_v6 }
 0x3c8   :  { %v699_v13 = vsub.f32 1.0, %v698_v8  ;;  %vm727_vm9 = vmor %vm725_vm8, %vm726_vm7 }
 0x3c9   :  { %v722_v57 = vsub.f32 1.0, %v721_v59 }
 0x3ca   :  { %v700_v15 = vmul.f32 %v1470_v4, %v699_v13 }
 0x3cb   :  { %v723_v18 = vmul.f32 %v1472_v6, %v722_v57 }
 0x3cc   :  { %v701_v19 = vadd.f32 %v1470_v4, %v700_v15 }
 0x3cd   :  { %v724_v24 = vadd.f32 %v1472_v6, %v723_v18 }
 0x3ce   :  { %v705_v22 = vsel %vm704_vm4, %v1470_v4, %v701_v19  ;;  %vm1282_vm4 = vcmask 1042432  }
 0x3cf   :  { %v710_v23 = vsel %vm707_vm6, %v709_v20, %v705_v22  ;;  %v728_v29 = vsel %vm727_vm9, %v1472_v6, %v724_v24  ;;  %vm1284_vm6 = vcmask 1043456  }
 0x3d0   :  { %v739_v25 = vmul.f32 %v737_v21, %v710_v23  ;;  %v733_v31 = vsel %vm730_vm10, %v732_v30, %v728_v29 }
 0x3d1   :  { %v742_v32 = vsub.f32 1.0, %v733_v31  ;;  %v746_v16 = vmul.f32 %v744_v33, %v733_v31 }
 0x3d2   :  { %v740_v28 = vadd.f32 %v739_v25, %v1828_v63 }
 0x3d4   :  { %1473 = vtanh.f32 %v740_v28 }
 0x3da   :  { %v1474_v9 = vpop.eup %1473 }
 0x3db   :  { %v743_v34 = vmul.f32 %v1474_v9, %v742_v32 }
 0x3dd   :  { %v747_v48 = vadd.f32 %v746_v16, %v743_v34 }
 0x3df   :  { %v1940_v49 = vrot.slane %v747_v48, 4 }
 0x3e1   :  { %1400 = vmatmul.msk.f32.vlgmr.msra.gmra.mxu1 %vm164_vm5, %v1940_v49  ;;  %1401 = vmatmul.msk.f32.vlgmr.msra.gmra.mxu2 %vm164_vm5, %v1940_v49  ;;  %v1240_v59 = vsel %vm1218_vm11, %v1940_v49, 0.0 }
 0x3e2   :  { %1402 = vmatmul.msk.f32.vlgmr.msra.gmra.mxu3 %vm164_vm5, %v1940_v49  ;;  %1039 = vmatpush.msra.mxu1 %v1756_v41  ;;  %v1241_v19 = vrot.slane %v1240_v59, 4 }
 0x3e3   :  { %1111 = vmatpush.msra.mxu2 %v1738_v35  ;;  %1131 = vmatpush.msra.mxu3 %v1740_v36 }
 0x3e4   :  { %1040 = vmatpush.msra.mxu1 %v1766_v44  ;;  %v1242_v23 = vadd.f32 %v1241_v19, %v1240_v59 }
 0x3e5   :  { %1112 = vmatpush.msra.mxu2 %v1745_v37  ;;  %1132 = vmatpush.msra.mxu3 %v1747_v38 }
 0x3e6   :  { %1041 = vmatpush.msra.mxu1 %v1776_v46  ;;  %v1243_v17 = vrot.slane %v1242_v23, 2 }
 0x3e7   :  { %1113 = vmatpush.msra.mxu2 %v1752_v39  ;;  %1133 = vmatpush.msra.mxu3 %v1754_v40 }
 0x3e8   :  { %1042 = vmatpush.msra.mxu1 %v1779_v47  ;;  %v1244_v31 = vadd.f32 %v1243_v17, %v1242_v23 }
 0x3e9   :  { %1114 = vmatpush.msra.mxu2 %v1762_v42  ;;  %1134 = vmatpush.msra.mxu3 %v1764_v43 }
 0x3ea   :  { %v1245_v9 = vrot.slane %v1244_v31, 1 }
 0x3ec   :  { %v1246_v48 = vadd.f32 %v1245_v9, %v1244_v31 }
 0x45e   :  { %v769_v35 = vpop.f32.mrf.mxu1 }
 0x45f   :  { %v812_v36 = vadd.f32 %v769_v35, %v1830_v1 }
 0x461   :  { %v1403_v63 = vmul.f32 -1.442695, %v812_v36  ;;  %v1283_v36 = vsel %vm1282_vm4, %v1933_v45, %v1246_v48  ;;  %v1292_v48 = vld [vmem:[%s2037_s8] sm:$0xff] }
 0x462   :  { %1295 = vperm.xlu2 %1432, %v1292_v48  }
 0x463   :  { %1475 = vpow2.f32 %v1403_v63 }
 0x464   :  { %v789_v37 = vpop.f32.mrf.mxu2 }
 0x465   :  { %v832_v38 = vadd.f32 %v789_v37, %v1832_v3  ;;  %v809_v62 = vpop.f32.mrf.mxu3 }
 0x466   :  { %v852_v55 = vadd.f32 %v1851_v27, %v809_v62 }
 0x467   :  { %v1404_v11 = vmul.f32 -1.442695, %v832_v38 }
 0x469   :  { %v1476_v50 = vpop.eup %1475  ;;  %1477 = vpow2.f32 %v1404_v11 }
 0x46a   :  { %v816_v39 = vadd.f32 1.0, %v1476_v50 }
 0x46c   :  { %1479 = vrcp.f32 %v816_v39  ;;  %v828_v43 = vand.u32 2147483648, %v816_v39  ;;  %v826_v58 = vand.u32 2147483647, %v816_v39  ;;  %vm822_vm13 = vweird.f32 %v816_v39 }
 0x46e   :  { %v829_v4 = vor.u32 1.1754944e-38, %v828_v43  ;;  %vm827_vm15 = vcmp.eq.f32.partialorder %v826_v58, 8.507059e+37 }
 0x46f   :  { %v1478_v40 = vpop.eup %1477 }
 0x470   :  { %v836_v52 = vadd.f32 1.0, %v1478_v40 }
 0x472   :  { %v1480_v53 = vpop.eup %1479  ;;  %1481 = vrcp.f32 %v836_v52  ;;  %v848_v57 = vand.u32 2147483648, %v836_v52  ;;  %v846_v15 = vand.u32 2147483647, %v836_v52  ;;  %vm842_vm1 = vweird.f32 %v836_v52 }
 0x473   :  { %v818_v42 = vmul.f32 %v1480_v53, %v816_v39  ;;  %vm823_vm12 = vweird.f32 %v1480_v53 }
 0x474   :  { %vm824_vm14 = vmor %vm822_vm13, %vm823_vm12  ;;  %v849_v20 = vor.u32 1.1754944e-38, %v848_v57  ;;  %vm847_vm3 = vcmp.eq.f32.partialorder %v846_v15, 8.507059e+37 }
 0x475   :  { %v819_v54 = vsub.f32 1.0, %v818_v42 }
 0x477   :  { %v820_v56 = vmul.f32 %v1480_v53, %v819_v54 }
 0x478   :  { %v1482_v60 = vpop.eup %1481 }
 0x479   :  { %v838_v0 = vmul.f32 %v1482_v60, %v836_v52  ;;  %v821_v2 = vadd.f32 %v1480_v53, %v820_v56  ;;  %vm843_vm0 = vweird.f32 %v1482_v60 }
 0x47a   :  { %vm844_vm2 = vmor %vm842_vm1, %vm843_vm0 }
 0x47b   :  { %v839_v6 = vsub.f32 1.0, %v838_v0  ;;  %v825_v8 = vsel %vm824_vm14, %v1480_v53, %v821_v2 }
 0x47c   :  { %v830_v13 = vsel %vm827_vm15, %v829_v4, %v825_v8 }
 0x47d   :  { %v840_v14 = vmul.f32 %v1482_v60, %v839_v6  ;;  %v853_v61 = vmul.f32 %v852_v55, %v830_v13 }
 0x47f   :  { %v841_v51 = vadd.f32 %v1482_v60, %v840_v14  ;;  %v854_v18 = vadd.f32 %v853_v61, %v1834_v5 }
 0x481   :  { %v845_v21 = vsel %vm844_vm2, %v1482_v60, %v841_v51  ;;  %1483 = vtanh.f32 %v854_v18 }
 0x482   :  { %v850_v22 = vsel %vm847_vm3, %v849_v20, %v845_v21 }
 0x483   :  { %v856_v24 = vsub.f32 1.0, %v850_v22  ;;  %v859_v28 = vmul.f32 %v850_v22, %v1940_v49 }
 0x487   :  { %v1484_v25 = vpop.eup %1483 }
 0x488   :  { %v857_v26 = vmul.f32 %v1484_v25, %v856_v24 }
 0x48a   :  { %v1967_v29 = vadd.f32 %v859_v28, %v857_v26 }
 0x48c   :  { %1405 = vmatmul.msk.f32.vlgmr.msra.gmra.mxu0 %vm164_vm5, %v1967_v29  ;;  %v1247_v30 = vsel %vm1218_vm11, %v1967_v29, 0.0  ;;  %1406 = vmatmul.msk.f32.vlgmr.msrb.gmra.mxu1 %vm164_vm5, %v1967_v29  ;;  %v979_v21 = vrot.slane %v1967_v29, 4 }
 0x48d   :  { %v1248_v32 = vrot.slane %v1247_v30, 4  ;;  %1407 = vmatmul.msk.f32.vlgmr.msrb.gmra.mxu2 %vm164_vm5, %v1967_v29  ;;  %1151 = vmatpush.msra.mxu0 %v1756_v41 }
 0x48f   :  { %v1249_v33 = vadd.f32 %v1248_v32, %v1247_v30  ;;  %1152 = vmatpush.msra.mxu0 %v1766_v44 }
 0x491   :  { %1153 = vmatpush.msra.mxu0 %v1776_v46  ;;  %v1250_v34 = vrot.slane %v1249_v33, 2 }
 0x493   :  { %1154 = vmatpush.msra.mxu0 %v1779_v47  ;;  %v1251_v16 = vadd.f32 %v1250_v34, %v1249_v33 }
 0x495   :  { %v1252_v49 = vrot.slane %v1251_v16, 1 }
 0x497   :  { %v1253_v35 = vadd.f32 %v1252_v49, %v1251_v16 }
 0x499   :  { %v1982_v63 = vsel %vm1284_vm6, %v1283_v36, %v1253_v35 }
 0x509   :  { %v881_v41 = vpop.f32.mrf.mxu0  ;;  %v901_v37 = vpop.f32.mrf.mxu1 }
 0x50a   :  { %v925_v38 = vrot.slane %v881_v41, 4  ;;  %v948_v44 = vrot.slane %v901_v37, 4 }
 0x50c   :  { %v927_v11 = vadd.f32 %v925_v38, %v1830_v1  ;;  %v950_v46 = vadd.f32 %v948_v44, %v1832_v3 }
 0x50e   :  { %v1408_v50 = vmul.f32 -1.442695, %v927_v11  ;;  %v1409_v47 = vmul.f32 -1.442695, %v950_v46 }
 0x510   :  { %1485 = vpow2.f32 %v1408_v50  ;;  %v921_v56 = vpop.f32.mrf.mxu2 }
 0x511   :  { %1487 = vpow2.f32 %v1409_v47  ;;  %v970_v0 = vadd.f32 %v1851_v27, %v921_v56 }
 0x513   :  { %v972_v55 = vrot.slane %v970_v0, 4 }
 0x516   :  { %v1486_v39 = vpop.eup %1485 }
 0x517   :  { %v1488_v40 = vpop.eup %1487  ;;  %v931_v52 = vadd.f32 1.0, %v1486_v39 }
 0x518   :  { %v954_v53 = vadd.f32 1.0, %v1488_v40 }
 0x519   :  { %1489 = vrcp.f32 %v931_v52  ;;  %v943_v1 = vand.u32 2147483648, %v931_v52  ;;  %v941_v3 = vand.u32 2147483647, %v931_v52  ;;  %vm937_vm8 = vweird.f32 %v931_v52 }
 0x51a   :  { %1491 = vrcp.f32 %v954_v53  ;;  %v966_v14 = vand.u32 2147483648, %v954_v53  ;;  %vm960_vm13 = vweird.f32 %v954_v53  ;;  %v964_v61 = vand.u32 2147483647, %v954_v53 }
 0x51b   :  { %v944_v6 = vor.u32 1.1754944e-38, %v943_v1  ;;  %vm942_vm10 = vcmp.eq.f32.partialorder %v941_v3, 8.507059e+37 }
 0x51c   :  { %v967_v18 = vor.u32 1.1754944e-38, %v966_v14  ;;  %vm965_vm15 = vcmp.eq.f32.partialorder %v964_v61, 8.507059e+37 }
 0x51f   :  { %v1490_v45 = vpop.eup %1489 }
 0x520   :  { %v1492_v42 = vpop.eup %1491  ;;  %v933_v54 = vmul.f32 %v1490_v45, %v931_v52  ;;  %vm938_vm7 = vweird.f32 %v1490_v45 }
 0x521   :  { %v956_v43 = vmul.f32 %v1492_v42, %v954_v53  ;;  %vm939_vm9 = vmor %vm937_vm8, %vm938_vm7  ;;  %vm961_vm12 = vweird.f32 %v1492_v42 }
 0x522   :  { %v934_v58 = vsub.f32 1.0, %v933_v54  ;;  %vm962_vm14 = vmor %vm960_vm13, %vm961_vm12 }
 0x523   :  { %v957_v60 = vsub.f32 1.0, %v956_v43 }
 0x524   :  { %v935_v62 = vmul.f32 %v1490_v45, %v934_v58 }
 0x525   :  { %v958_v2 = vmul.f32 %v1492_v42, %v957_v60 }
 0x526   :  { %v936_v4 = vadd.f32 %v1490_v45, %v935_v62 }
 0x527   :  { %v959_v13 = vadd.f32 %v1492_v42, %v958_v2 }
 0x528   :  { %v940_v8 = vsel %vm939_vm9, %v1490_v45, %v936_v4  ;;  %vm1286_vm9 = vcmask 1044480  }
 0x529   :  { %v945_v59 = vsel %vm942_vm10, %v944_v6, %v940_v8  ;;  %v963_v51 = vsel %vm962_vm14, %v1492_v42, %v959_v13  ;;  %vm1288_vm10 = vcmask 1045504  }
 0x52a   :  { %v974_v57 = vmul.f32 %v972_v55, %v945_v59  ;;  %v968_v19 = vsel %vm965_vm15, %v967_v18, %v963_v51 }
 0x52b   :  { %v977_v20 = vsub.f32 1.0, %v968_v19  ;;  %v981_v24 = vmul.f32 %v979_v21, %v968_v19 }
 0x52c   :  { %v975_v15 = vadd.f32 %v974_v57, %v1834_v5 }
 0x52e   :  { %1493 = vtanh.f32 %v975_v15 }
 0x534   :  { %v1494_v22 = vpop.eup %1493 }
 0x535   :  { %v978_v23 = vmul.f32 %v1494_v22, %v977_v20 }
 0x537   :  { %v982_v25 = vadd.f32 %v981_v24, %v978_v23 }
 0x539   :  { %v984_v17 = vrot.slane %v982_v25, 4 }
 0x53b   :  { %1410 = vmatmul.msk.f32.vlgmr.msrb.gmra.mxu3 %vm164_vm5, %v984_v17  ;;  %1411 = vmatmul.msk.f32.vlgmr.msrb.gmra.mxu0 %vm164_vm5, %v984_v17  ;;  %v1254_v43 = vsel %vm1218_vm11, %v984_v17, 0.0 }
 0x53c   :  { %1412 = vmatmul.msk.f32.vlgmr.msra.gmra.mxu1 %vm164_vm5, %v984_v17  ;;  %v1255_v1 = vrot.slane %v1254_v43, 4 }
 0x53e   :  { %v1256_v3 = vadd.f32 %v1255_v1, %v1254_v43 }
 0x540   :  { %v1257_v8 = vrot.slane %v1256_v3, 2 }
 0x542   :  { %v1258_v59 = vadd.f32 %v1257_v8, %v1256_v3 }
 0x544   :  { %v1259_v61 = vrot.slane %v1258_v59, 1 }
 0x546   :  { %v1260_v18 = vadd.f32 %v1259_v61, %v1258_v59 }
 0x548   :  { %v1287_v21 = vsel %vm1286_vm9, %v1982_v63, %v1260_v18 }
 0x5b8   :  { %v1024_v5 = vpop.f32.mrf.mxu0 }
 0x5b9   :  { %v1067_v26 = vadd.f32 %v1024_v5, %v1840_v10  ;;  %v1044_v50 = vpop.f32.mrf.mxu1 }
 0x5ba   :  { %v1087_v40 = vadd.f32 %v1851_v27, %v1044_v50 }
 0x5bb   :  { %v1414_v28 = vmul.f32 -1.442695, %v1067_v26 }
 0x5bd   :  { %1495 = vpow2.f32 %v1414_v28 }
 0x5be   :  { %v1004_v30 = vpop.f32.mrf.mxu3 }
 0x5bf   :  { %v1047_v31 = vadd.f32 %v1004_v30, %v1836_v7 }
 0x5c1   :  { %v1413_v29 = vmul.f32 -1.442695, %v1047_v31 }
 0x5c3   :  { %v1496_v32 = vpop.eup %1495  ;;  %1497 = vpow2.f32 %v1413_v29 }
 0x5c4   :  { %v1071_v33 = vadd.f32 1.0, %v1496_v32 }
 0x5c6   :  { %1499 = vrcp.f32 %v1071_v33  ;;  %v1083_v42 = vand.u32 2147483648, %v1071_v33  ;;  %vm1077_vm6 = vweird.f32 %v1071_v33  ;;  %v1081_v56 = vand.u32 2147483647, %v1071_v33 }
 0x5c8   :  { %v1084_v62 = vor.u32 1.1754944e-38, %v1083_v42  ;;  %vm1082_vm8 = vcmp.eq.f32.partialorder %v1081_v56, 8.507059e+37  ;;  %v1313_v42 = vld [vmem:[#allocation5] sm:$0xff] }
 0x5c9   :  { %v1498_v9 = vpop.eup %1497 }
 0x5ca   :  { %v1051_v34 = vadd.f32 1.0, %v1498_v9 }
 0x5cc   :  { %1501 = vrcp.f32 %v1051_v34  ;;  %v1500_v16 = vpop.eup %1499  ;;  %v1063_v38 = vand.u32 2147483648, %v1051_v34  ;;  %v1061_v11 = vand.u32 2147483647, %v1051_v34  ;;  %vm1057_vm1 = vweird.f32 %v1051_v34 }
 0x5cd   :  { %v1073_v49 = vmul.f32 %v1500_v16, %v1071_v33  ;;  %vm1078_vm4 = vweird.f32 %v1500_v16 }
 0x5ce   :  { %v1064_v39 = vor.u32 1.1754944e-38, %v1063_v38  ;;  %vm1062_vm3 = vcmp.eq.f32.partialorder %v1061_v11, 8.507059e+37  ;;  %vm1079_vm7 = vmor %vm1077_vm6, %vm1078_vm4  ;;  %v1316_v38 = vld [vmem:[#allocation5 + $0x18] sm:$0xff] }
 0x5cf   :  { %v1074_v41 = vsub.f32 1.0, %v1073_v49  ;;  %1336 = vmatpush.msrb.mxu1 %v1316_v38 }
 0x5d1   :  { %v1075_v46 = vmul.f32 %v1500_v16, %v1074_v41 }
 0x5d2   :  { %v1502_v35 = vpop.eup %1501 }
 0x5d3   :  { %v1053_v36 = vmul.f32 %v1502_v35, %v1051_v34  ;;  %vm1058_vm0 = vweird.f32 %v1502_v35  ;;  %v1076_v53 = vadd.f32 %v1500_v16, %v1075_v46  ;;  %v1315_v46 = vld [vmem:[#allocation5 + $0x10] sm:$0xff] }
 0x5d4   :  { %vm1059_vm2 = vmor %vm1057_vm1, %vm1058_vm0  ;;  %1337 = vmatpush.msrb.mxu1 %v1315_v46 }
 0x5d5   :  { %v1054_v37 = vsub.f32 1.0, %v1053_v36  ;;  %v1080_v60 = vsel %vm1079_vm7, %v1500_v16, %v1076_v53 }
 0x5d6   :  { %v1085_v27 = vsel %vm1082_vm8, %v1084_v62, %v1080_v60  ;;  %vm1290_vm8 = vcmask 1046528  }
 0x5d7   :  { %v1055_v44 = vmul.f32 %v1502_v35, %v1054_v37  ;;  %v1091_v0 = vsub.f32 1.0, %v1085_v27  ;;  %v1094_v6 = vmul.f32 %v1085_v27, %v984_v17 }
 0x5d9   :  { %v1056_v47 = vadd.f32 %v1502_v35, %v1055_v44 }
 0x5db   :  { %v1060_v52 = vsel %vm1059_vm2, %v1502_v35, %v1056_v47 }
 0x5dc   :  { %v1065_v45 = vsel %vm1062_vm3, %v1064_v39, %v1060_v52 }
 0x5dd   :  { %v1088_v54 = vmul.f32 %v1087_v40, %v1065_v45  ;;  %v1314_v40 = vld [vmem:[#allocation5 + $0x8] sm:$0xff]  ;;  %v1296_v45 = vpop.permute.xlu2 %1295 }
 0x5de   :  { %1338 = vmatpush.msrb.mxu1 %v1314_v40  ;;  %vm1303_vm4 = vweird.f32 %v1296_v45  ;;  %v1309_v18 = vand.u32 2147483648, %v1296_v45 }
 0x5df   :  { %v1089_v58 = vadd.f32 %v1088_v54, %v1842_v12 }
 0x5e0   :  { %1339 = vmatpush.msrb.mxu1 %v1313_v42 }
 0x5e1   :  { %1503 = vtanh.f32 %v1089_v58 }
 0x5e7   :  { %v1504_v2 = vpop.eup %1503 }
 0x5e8   :  { %v1092_v4 = vmul.f32 %v1504_v2, %v1091_v0 }
 0x5ea   :  { %v2000_v55 = vadd.f32 %v1094_v6, %v1092_v4 }
 0x5ec   :  { %1415 = vmatmul.msk.f32.vlgmr.msra.gmra.mxu2 %vm164_vm5, %v2000_v55  ;;  %1416 = vmatmul.msk.f32.vlgmr.msra.gmra.mxu3 %vm164_vm5, %v2000_v55  ;;  %v1261_v13 = vsel %vm1218_vm11, %v2000_v55, 0.0  ;;  %v1214_v0 = vrot.slane %v2000_v55, 4 }
 0x5ed   :  { %1417 = vmatmul.msk.f32.vlgmr.msra.gmra.mxu0 %vm164_vm5, %v2000_v55  ;;  %v1262_v14 = vrot.slane %v1261_v13, 4 }
 0x5ef   :  { %v1263_v57 = vadd.f32 %v1262_v14, %v1261_v13 }
 0x5f1   :  { %v1264_v15 = vrot.slane %v1263_v57, 2 }
 0x5f3   :  { %v1265_v51 = vadd.f32 %v1264_v15, %v1263_v57 }
 0x5f5   :  { %v1266_v19 = vrot.slane %v1265_v51, 1 }
 0x5f7   :  { %v1267_v20 = vadd.f32 %v1266_v19, %v1265_v51 }
 0x5f9   :  { %v2011_v22 = vsel %vm1288_vm10, %v1287_v21, %v1267_v20  ;;  %v1307_v20 = vand.u32 2147483647, %v1296_v45 }
 0x5fb   :  { %vm1308_vm9 = vcmp.eq.f32.partialorder %v1307_v20, 8.507059e+37 }
 0x66a   :  { %v1156_v16 = vpop.f32.mrf.mxu0 }
 0x66f   :  { %v1116_v23 = vpop.f32.mrf.mxu2  ;;  %v1136_v24 = vpop.f32.mrf.mxu3 }
 0x670   :  { %v1160_v25 = vrot.slane %v1116_v23, 4  ;;  %v1183_v17 = vrot.slane %v1136_v24, 4  ;;  %v1310_v23 = vor.u32 1.1754944e-38, %v1309_v18 }
 0x672   :  { %v1162_v5 = vadd.f32 %v1160_v25, %v1836_v7  ;;  %v1185_v26 = vadd.f32 %v1183_v17, %v1840_v10  ;;  %v1517_v10 = vld [vmem:[%s2034_s5] ss:$0 sm:$0xff] }
 0x673   :  { %v1205_v36 = vadd.f32 %v1517_v10, %v1156_v16 }
 0x674   :  { %v1418_v28 = vmul.f32 -1.442695, %v1162_v5  ;;  %v1419_v30 = vmul.f32 -1.442695, %v1185_v26 }
 0x675   :  { %v1207_v47 = vrot.slane %v1205_v36, 4 }
 0x676   :  { %1505 = vpow2.f32 %v1418_v28  ;;  %v1434_v28 = vld [vmem:[%s2036_s7] ss:$0 sm:$0xff] }
 0x677   :  { %1507 = vpow2.f32 %v1419_v30 }
 0x67c   :  { %v1506_v31 = vpop.eup %1505 }
 0x67d   :  { %v1508_v29 = vpop.eup %1507  ;;  %v1166_v32 = vadd.f32 1.0, %v1506_v31 }
 0x67e   :  { %v1189_v33 = vadd.f32 1.0, %v1508_v29 }
 0x67f   :  { %1509 = vrcp.f32 %v1166_v32  ;;  %v1178_v35 = vand.u32 2147483648, %v1166_v32  ;;  %v1176_v37 = vand.u32 2147483647, %v1166_v32  ;;  %vm1172_vm13 = vweird.f32 %v1166_v32 }
 0x680   :  { %1511 = vrcp.f32 %v1189_v33  ;;  %v1201_v43 = vand.u32 2147483648, %v1189_v33  ;;  %vm1195_vm1 = vweird.f32 %v1189_v33  ;;  %v1199_v56 = vand.u32 2147483647, %v1189_v33 }
 0x681   :  { %v1179_v50 = vor.u32 1.1754944e-38, %v1178_v35  ;;  %vm1177_vm15 = vcmp.eq.f32.partialorder %v1176_v37, 8.507059e+37  ;;  %1513 = vrcp.f32 %v1296_v45 }
 0x682   :  { %v1202_v1 = vor.u32 1.1754944e-38, %v1201_v43  ;;  %vm1200_vm3 = vcmp.eq.f32.partialorder %v1199_v56, 8.507059e+37 }
 0x685   :  { %v1510_v63 = vpop.eup %1509 }
 0x686   :  { %v1512_v9 = vpop.eup %1511  ;;  %v1168_v34 = vmul.f32 %v1510_v63, %v1166_v32  ;;  %vm1173_vm12 = vweird.f32 %v1510_v63 }
 0x687   :  { %v1191_v48 = vmul.f32 %v1512_v9, %v1189_v33  ;;  %vm1174_vm14 = vmor %vm1172_vm13, %vm1173_vm12  ;;  %vm1196_vm0 = vweird.f32 %v1512_v9  ;;  %v1514_v27 = vpop.eup %1513 }
 0x688   :  { %v1169_v49 = vsub.f32 1.0, %v1168_v34  ;;  %vm1197_vm2 = vmor %vm1195_vm1, %vm1196_vm0  ;;  %v1299_v8 = vmul.f32 %v1514_v27, %v1296_v45  ;;  %vm1304_vm6 = vweird.f32 %v1514_v27 }
 0x689   :  { %v1192_v7 = vsub.f32 1.0, %v1191_v48  ;;  %vm1305_vm7 = vmor %vm1303_vm4, %vm1304_vm6 }
 0x68a   :  { %v1170_v41 = vmul.f32 %v1510_v63, %v1169_v49  ;;  %v1300_v14 = vsub.f32 1.0, %v1299_v8 }
 0x68b   :  { %v1193_v44 = vmul.f32 %v1512_v9, %v1192_v7 }
 0x68c   :  { %v1171_v11 = vadd.f32 %v1510_v63, %v1170_v41  ;;  %v1301_v61 = vmul.f32 %v1514_v27, %v1300_v14 }
 0x68d   :  { %v1194_v53 = vadd.f32 %v1512_v9, %v1193_v44 }
 0x68e   :  { %v1175_v39 = vsel %vm1174_vm14, %v1510_v63, %v1171_v11  ;;  %v1302_v19 = vadd.f32 %v1514_v27, %v1301_v61 }
 0x68f   :  { %v1180_v52 = vsel %vm1177_vm15, %v1179_v50, %v1175_v39  ;;  %v1198_v60 = vsel %vm1197_vm2, %v1512_v9, %v1194_v53 }
 0x690   :  { %v1209_v54 = vmul.f32 %v1207_v47, %v1180_v52  ;;  %v1203_v62 = vsel %vm1200_vm3, %v1202_v1, %v1198_v60  ;;  %v1306_v24 = vsel %vm1305_vm7, %v1514_v27, %v1302_v19 }
 0x691   :  { %v1212_v3 = vsub.f32 1.0, %v1203_v62  ;;  %v1216_v6 = vmul.f32 %v1214_v0, %v1203_v62  ;;  %v1311_v5 = vsel %vm1308_vm9, %v1310_v23, %v1306_v24 }
 0x692   :  { %v1210_v58 = vadd.f32 %v1209_v54, %v1842_v12 }
 0x694   :  { %1515 = vtanh.f32 %v1210_v58 }
 0x69a   :  { %v1516_v2 = vpop.eup %1515 }
 0x69b   :  { %v1213_v4 = vmul.f32 %v1516_v2, %v1212_v3 }
 0x69d   :  { %v1217_v59 = vadd.f32 %v1216_v6, %v1213_v4 }
 0x69f   :  { %v1269_v13 = vrot.slane %v1217_v59, 4 }
 0x6a1   :  { %v1271_v12 = vsel %vm1218_vm11, %v1269_v13, 0.0 }
 0x6a2   :  { %v1272_v57 = vrot.slane %v1271_v12, 4 }
 0x6a4   :  { %v1273_v15 = vadd.f32 %v1272_v57, %v1271_v12 }
 0x6a6   :  { %v1274_v51 = vrot.slane %v1273_v15, 2 }
 0x6a8   :  { %v1275_v21 = vadd.f32 %v1274_v51, %v1273_v15 }
 0x6aa   :  { %v1276_v55 = vrot.slane %v1275_v21, 1 }
 0x6ac   :  { %v1277_v25 = vadd.f32 %v1276_v55, %v1275_v21 }
 0x6ae   :  { %v1291_v17 = vsel %vm1290_vm8, %v2011_v22, %v1277_v25 }
 0x6af   :  { %v1312_v26 = vmul.f32 %v1311_v5, %v1291_v17 }
 0x6b1   :  { %1420 = vmatmul.msk.f32.vlgmr.msrb.gmra.mxu1 %vm164_vm5, %v1312_v26 }
 0x72e   :  { %v1341_v30 = vpop.f32.mrf.mxu1 }
 0x72f   :  { %v1342_v31 = vadd.f32 %v1434_v28, %v1341_v30 }
 0x731   :  { %1344 = vst [vmem:[#allocation7] sm:$0xff] %v1342_v31 }
 0x732   :  { %1355 = dma.vmem_to_hbm [thread:$0]  %s1351_s25, 128, %s1353_s27, [#allocation4]  }
 0x733   :  { %1594 = dma.done.wait [#allocation4], 128  }
 0x734   :  { %1595 = vsyncadd [#allocation4], 4294967168 }
 0x735   :  { %1360 = vsyncpa [#allocation3], 1 }
 0x736   :  { %1361 = vsyncpa [#allocation6], 1 }
 0x737   :  { %1362 = vsyncpa [#allocation4], 1 }

</bundles_post_ra>
